<compile_context>
chip_gen: v6e
topology: v6e:2x2x1
jax: 0.10.0
libtpu: 0.0.40
codegen_flags: <defaults>
</compile_context>

<pallas_src>
import functools

import jax
import jax.numpy as jnp
from jax import lax
from jax.experimental import pallas as pl
from jax.experimental.pallas import tpu as pltpu


def _sigmoid_tanh_form(x):
    # sigmoid(x) == 0.5 * tanh(0.5 * x) + 0.5 : a single EUP op (tanh) per
    # element on all TPU generations; the scale/offset ride in free VPU slots.
    return 0.5 * jnp.tanh(0.5 * x) + 0.5


def _convlstm_kernel(w_ref, x_ref, c_ref, h_out_ref, c_out_ref, *, hid, gate_dtype):
    """Single invocation; whole batch folded into the lane (N) axis.

    w_ref: (4*hid, KPAD)      bf16 folded conv weight (+ bias column).
    x_ref: (KPAD, B*HW)       bf16 tap-major im2col of [x; h] (+ ones row).
    c_ref: (hid, B*HW)        f32 previous cell state.
    h_out_ref / c_out_ref: (hid, B*HW) f32 outputs (lane-dense).
    """
    # Whole conv (all taps, all batch elements) + bias in ONE MXU matmul,
    # f32 accumulation.
    acc = jnp.dot(w_ref[...], x_ref[...],
                  preferred_element_type=jnp.float32)          # (4*hid, B*HW)

    # Per-gate consumption keeps the live-vreg footprint small; gate
    # pre-activations cast to `gate_dtype` (bf16 on v6e/v7x EUP, f32 on v5e),
    # state arithmetic stays f32.
    i = _sigmoid_tanh_form(acc[0 * hid:1 * hid, :].astype(gate_dtype)
                           ).astype(jnp.float32)
    g = jnp.tanh(acc[3 * hid:4 * hid, :].astype(gate_dtype)).astype(jnp.float32)
    ig = i * g
    f = _sigmoid_tanh_form(acc[1 * hid:2 * hid, :].astype(gate_dtype)
                           ).astype(jnp.float32)
    c_next = f * c_ref[...] + ig
    c_out_ref[...] = c_next.astype(c_out_ref.dtype)

    o = _sigmoid_tanh_form(acc[2 * hid:3 * hid, :].astype(gate_dtype)
                           ).astype(jnp.float32)
    # tanh(c_next) kept in f32: it feeds h directly and is only hid rows
    # (~20% of the transcendental work), so the precision/EUP trade favors f32.
    h_out_ref[...] = (o * jnp.tanh(c_next)).astype(h_out_ref.dtype)


def _gate_dtype_for_backend():
    """bf16 gate pre-activations only where the EUP has a bf16 path."""
    try:
        kind = jax.devices()[0].device_kind.lower()
    except Exception:
        return jnp.float32
    if ("v6" in kind) or ("v7" in kind):
        return jnp.bfloat16
    return jnp.float32


def conv_lstm_cell(x_nchw, h_nchw, c_nchw, weight_oihw, bias, kernel_size):
    """ConvLSTMCell.forward: returns (h_next, c_next), both NCHW."""
    B, Cin, H, W = x_nchw.shape
    HID = h_nchw.shape[1]
    kh, kw = kernel_size
    ph, pw = kh // 2, kw // 2
    CTOT = Cin + HID
    HWf = H * W
    N = B * HWf
    KHW = kh * kw
    K_eff = KHW * CTOT
    KPAD = ((K_eff + 1 + 127) // 128) * 128   # +1 for the folded-bias row
    # NOTE: KPAD - (K_eff + 1) rows are zero padding (~15% MXU/DMA waste at
    # this size); kernel is EUP-bound, so intentionally left as-is.

    # --- glue (plain JAX): concat, EARLY bf16 cast, pad, tap-major im2col ---
    # Cast to bf16 before the kh*kw tap materialization so the inflated
    # im2col intermediate is written in bf16 (half the wrapper HBM traffic).
    comb = jnp.concatenate([x_nchw, h_nchw], axis=1).astype(jnp.bfloat16)    # (B, CTOT, H, W)
    comb_p = jnp.pad(comb, ((0, 0), (0, 0), (ph, ph), (pw, pw)))             # spatial pad

    # taps[t, b, c, y*W+x] = comb_p[b, c, y+ky, x+kx], t = ky*kw + kx
    taps = jnp.stack(
        [comb_p[:, :, ky:ky + H, kx:kx + W].reshape(B, CTOT, HWf)
         for ky in range(kh) for kx in range(kw)], axis=0)                   # (KHW, B, CTOT, HWf)
    # K ordering: tap-major, channel-minor (matches the weight fold below);
    # lane ordering: batch-major, spatial-minor.
    x_fold = jnp.transpose(taps, (0, 2, 1, 3)).reshape(K_eff, N)
    x_fold = jnp.concatenate(
        [x_fold,
         jnp.ones((1, N), jnp.bfloat16),                                     # bias row
         jnp.zeros((KPAD - K_eff - 1, N), jnp.bfloat16)],
        axis=0)                                                              # (KPAD, N)
    # TODO(synk): at large H*W*CTOT, build the im2col inside the kernel from
    # the padded frame (shifted pl.ds / pltpu.roll matmuls) to remove the
    # kh*kw HBM inflation of this wrapper-side fold.

    # PyTorch conv weight (4*HID, CTOT, kh, kw) -> (4*HID, KHW*CTOT) with the
    # same tap-major K ordering; bias folded as one extra K column.
    w_fold = jnp.transpose(weight_oihw, (0, 2, 3, 1)).reshape(4 * HID, K_eff)
    w_fold = jnp.concatenate(
        [w_fold, bias[:, None],
         jnp.zeros((4 * HID, KPAD - K_eff - 1), w_fold.dtype)],
        axis=1).astype(jnp.bfloat16)                                         # (4*HID, KPAD)

    # Cell state: channels on sublanes, (batch, spatial) folded on lanes.
    c_cur = jnp.transpose(c_nchw.reshape(B, HID, HWf), (1, 0, 2)
                          ).reshape(HID, N).astype(jnp.float32)

    gate_dtype = _gate_dtype_for_backend()
    kernel = functools.partial(_convlstm_kernel, hid=HID, gate_dtype=gate_dtype)

    # Single kernel invocation (no grid): batch is part of the matmul lane/N
    # axis, so there is no per-grid-step overhead and every store is
    # lane-dense.  Everything here fits comfortably in VMEM (<1 MiB total).
    # TODO(synk): for large B*H*W, add a grid axis tiling the lane (N) axis in
    # >=512-lane chunks marked "parallel" and set vmem_limit_bytes so the
    # double-buffered working set fits v7x's 64 MiB VMEM.
    h_flat, c_flat = pl.pallas_call(
        kernel,
        out_shape=(jax.ShapeDtypeStruct((HID, N), jnp.float32),
                   jax.ShapeDtypeStruct((HID, N), jnp.float32)),
        in_specs=[
            pl.BlockSpec(memory_space=pltpu.MemorySpace.VMEM),   # weights
            pl.BlockSpec(memory_space=pltpu.MemorySpace.VMEM),   # folded [x; h]
            pl.BlockSpec(memory_space=pltpu.MemorySpace.VMEM),   # c_cur
        ],
        out_specs=(
            pl.BlockSpec(memory_space=pltpu.MemorySpace.VMEM),
            pl.BlockSpec(memory_space=pltpu.MemorySpace.VMEM),
        ),
    )(w_fold, x_fold, c_cur)

    h_next = jnp.transpose(h_flat.reshape(HID, B, H, W), (1, 0, 2, 3))
    c_next = jnp.transpose(c_flat.reshape(HID, B, H, W), (1, 0, 2, 3))
    return h_next, c_next


def _reference(x, h, c, weight, bias, kernel_size):
    """Pure-JAX f32 reference matching the PyTorch forward exactly (NCHW)."""
    kh, kw = kernel_size
    comb = jnp.concatenate([x, h], axis=1)
    out = lax.conv_general_dilated(
        comb, weight, window_strides=(1, 1),
        padding=((kh // 2, kh // 2), (kw // 2, kw // 2)),
        dimension_numbers=('NCHW', 'OIHW', 'NCHW'))
    out = out + bias[None, :, None, None]
    cc_i, cc_f, cc_o, cc_g = jnp.split(out, 4, axis=1)
    i = jax.nn.sigmoid(cc_i)
    f = jax.nn.sigmoid(cc_f)
    o = jax.nn.sigmoid(cc_o)
    g = jnp.tanh(cc_g)
    c_next = f * c + i * g
    h_next = o * jnp.tanh(c_next)
    return h_next, c_next


if __name__ == "__main__":
    # ConvLSTMCell(input_size=(16,16), input_dim=4, hidden_dim=32,
    #              kernel_size=(3,3), bias=True)
    B, Cin, H, W = 2, 4, 16, 16
    HID = 32
    ksize = (3, 3)

    key = jax.random.PRNGKey(0)
    k1, k2, k3, k4, k5 = jax.random.split(key, 5)
    x = jax.random.normal(k1, (B, Cin, H, W), jnp.float32)
    h0 = jax.random.normal(k2, (B, HID, H, W), jnp.float32)
    c0 = jax.random.normal(k3, (B, HID, H, W), jnp.float32)
    # Deterministic synthetic params (nn.Conv2d shapes: (4*HID, Cin+HID, kh, kw))
    weight = 0.1 * jax.random.normal(k4, (4 * HID, Cin + HID, *ksize), jnp.float32)
    bias = 0.1 * jax.random.normal(k5, (4 * HID,), jnp.float32)

    h_next, c_next = conv_lstm_cell(x, h0, c0, weight, bias, ksize)
    jax.block_until_ready((h_next, c_next))

    # Tolerance admits bf16 MXU operands and (on v6e/v7x) bf16 gate
    # pre-activations; accumulation and state math are f32.
    h_exp, c_exp = _reference(x, h0, c0, weight, bias, ksize)
    assert jnp.allclose(h_next, h_exp, rtol=3e-2, atol=3e-2), "h_next mismatch"
    assert jnp.allclose(c_next, c_exp, rtol=3e-2, atol=3e-2), "c_next mismatch"

    print("KERNEL_OK")
</pallas_src>

<mosaic_0001>
module attributes {stable_mosaic.version = 11 : i64} {
  func.func @_convlstm_kernel(%arg0: memref<128x384xbf16, #tpu.memory_space<vmem>>, %arg1: memref<384x512xbf16, #tpu.memory_space<vmem>>, %arg2: memref<32x512xf32, #tpu.memory_space<vmem>>, %arg3: memref<32x512xf32, #tpu.memory_space<vmem>>, %arg4: memref<32x512xf32, #tpu.memory_space<vmem>>) attributes {dimension_semantics = [], scalar_prefetch = 0 : i64, scratch_operands = 0 : i64, tpu.core_type = #tpu.core_type<tc>} {
    %c0 = arith.constant 0 : index
    %c0_0 = arith.constant 0 : index
    %0 = vector.load %arg0[%c0, %c0_0] : memref<128x384xbf16, #tpu.memory_space<vmem>>, vector<128x384xbf16>
    %c0_1 = arith.constant 0 : index
    %c0_2 = arith.constant 0 : index
    %1 = vector.load %arg1[%c0_1, %c0_2] : memref<384x512xbf16, #tpu.memory_space<vmem>>, vector<384x512xbf16>
    %cst = arith.constant dense<0.000000e+00> : vector<128x512xf32>
    %2 = tpu.matmul %0, %1, %cst {dimension_numbers = #tpu.dot_dimension_numbers<[1], [0], [0], [1], [0, 0, 1, 1], [], []>} : vector<128x384xbf16>, vector<384x512xbf16>, vector<128x512xf32> -> vector<128x512xf32>
    %3 = vector.extract_strided_slice %2 {offsets = [0, 0], sizes = [32, 512], strides = [1, 1]} : vector<128x512xf32> to vector<32x512xf32>
    %cst_3 = arith.constant 5.000000e-01 : f32
    %4 = vector.broadcast %cst_3 : f32 to vector<32x512xf32>
    %5 = arith.mulf %4, %3 : vector<32x512xf32>
    %6 = math.tanh %5 : vector<32x512xf32>
    %cst_4 = arith.constant 5.000000e-01 : f32
    %7 = vector.broadcast %cst_4 : f32 to vector<32x512xf32>
    %8 = arith.mulf %7, %6 : vector<32x512xf32>
    %cst_5 = arith.constant 5.000000e-01 : f32
    %9 = vector.broadcast %cst_5 : f32 to vector<32x512xf32>
    %10 = arith.addf %8, %9 : vector<32x512xf32>
    %11 = vector.extract_strided_slice %2 {offsets = [96, 0], sizes = [32, 512], strides = [1, 1]} : vector<128x512xf32> to vector<32x512xf32>
    %12 = math.tanh %11 : vector<32x512xf32>
    %13 = arith.mulf %10, %12 : vector<32x512xf32>
    %14 = vector.extract_strided_slice %2 {offsets = [32, 0], sizes = [32, 512], strides = [1, 1]} : vector<128x512xf32> to vector<32x512xf32>
    %cst_6 = arith.constant 5.000000e-01 : f32
    %15 = vector.broadcast %cst_6 : f32 to vector<32x512xf32>
    %16 = arith.mulf %15, %14 : vector<32x512xf32>
    %17 = math.tanh %16 : vector<32x512xf32>
    %cst_7 = arith.constant 5.000000e-01 : f32
    %18 = vector.broadcast %cst_7 : f32 to vector<32x512xf32>
    %19 = arith.mulf %18, %17 : vector<32x512xf32>
    %cst_8 = arith.constant 5.000000e-01 : f32
    %20 = vector.broadcast %cst_8 : f32 to vector<32x512xf32>
    %21 = arith.addf %19, %20 : vector<32x512xf32>
    %c0_9 = arith.constant 0 : index
    %c0_10 = arith.constant 0 : index
    %22 = vector.load %arg2[%c0_9, %c0_10] : memref<32x512xf32, #tpu.memory_space<vmem>>, vector<32x512xf32>
    %23 = arith.mulf %21, %22 : vector<32x512xf32>
    %24 = arith.addf %23, %13 : vector<32x512xf32>
    %c0_11 = arith.constant 0 : index
    %c0_12 = arith.constant 0 : index
    %25 = vector.load %arg4[%c0_11, %c0_12] : memref<32x512xf32, #tpu.memory_space<vmem>>, vector<32x512xf32>
    tpu.vector_store %arg4[%c0_11, %c0_12], %24 {strides = array<i32>} : memref<32x512xf32, #tpu.memory_space<vmem>>, vector<32x512xf32>,
    %26 = vector.extract_strided_slice %2 {offsets = [64, 0], sizes = [32, 512], strides = [1, 1]} : vector<128x512xf32> to vector<32x512xf32>
    %cst_13 = arith.constant 5.000000e-01 : f32
    %27 = vector.broadcast %cst_13 : f32 to vector<32x512xf32>
    %28 = arith.mulf %27, %26 : vector<32x512xf32>
    %29 = math.tanh %28 : vector<32x512xf32>
    %cst_14 = arith.constant 5.000000e-01 : f32
    %30 = vector.broadcast %cst_14 : f32 to vector<32x512xf32>
    %31 = arith.mulf %30, %29 : vector<32x512xf32>
    %cst_15 = arith.constant 5.000000e-01 : f32
    %32 = vector.broadcast %cst_15 : f32 to vector<32x512xf32>
    %33 = arith.addf %31, %32 : vector<32x512xf32>
    %34 = math.tanh %24 : vector<32x512xf32>
    %35 = arith.mulf %33, %34 : vector<32x512xf32>
    %c0_16 = arith.constant 0 : index
    %c0_17 = arith.constant 0 : index
    %36 = vector.load %arg3[%c0_16, %c0_17] : memref<32x512xf32, #tpu.memory_space<vmem>>, vector<32x512xf32>
    tpu.vector_store %arg3[%c0_16, %c0_17], %35 {strides = array<i32>} : memref<32x512xf32, #tpu.memory_space<vmem>>, vector<32x512xf32>,
    return
  }
}

</mosaic_0001>

<bundles_post_ra>
// kernel: tpu_custom_call.1
= control target key start
LH: loop header
LB: loop body
LE: loop exit
PB: predicated region body
PF: predicated region fallthrough
CT: control target
= control target key end

     0   :  { %10 = vsyncpa [#allocation3], 0  ;;  %s2597_s0 = inlined_call_operand.hbm [shape: bf16[128,384], index: 0, kind: input, shape index: {}]   ;;  %s2598_s1 = inlined_call_operand.hbm [shape: bf16[384,512], index: 1, kind: input, shape index: {}]   ;;  %s2599_s2 = inlined_call_operand.hbm [shape: f32[32,512], index: 2, kind: input, shape index: {}]   ;;  %s2600_s3 = inlined_call_operand.hbm [shape: f32[32,512], index: 3, kind: output, shape index: {0}]   ;;  %s2601_s4 = inlined_call_operand.hbm [shape: f32[32,512], index: 4, kind: output, shape index: {1}]  }
   0x1   :  { %11 = vsyncpa [#allocation6], 0 }
   0x2   :  { %12 = vsyncpa [#allocation4], 0 }
   0x3   :  { %13 = vsyncpa [#allocation10], 0  ;;  %s2210_s15 = smov [#allocation5]  }
   0x4   :  { %s31_s16 = sshll.u32 %s2210_s15, 4  ;;  %s32_s16 = int_to_ptr.vmem [resolvable:$true] %s31_s16 }
   0x5   :  { %s2110_s17 = scalar_lea.vmem %s32_s16, 12288  ;;  %p2115_p1 = scmp.lt.s32.totalorder %s32_s16, %s32_s16 }
   0x6   :  { %p2111_p0 = scmp.ne.s32.totalorder %s32_s16, %s2110_s17  ;;  %p2116_p2 = scmp.lt.s32.totalorder %s2110_s17, %s2110_s17 }
   0x8   :  { %p2117_p3 = por %p2116_p2, %p2115_p1 }
   0xa   :  { %p2118_p4 = pnand %p2117_p3, %p2111_p0 }
   0xc   :  { %2121 = shalt.err (!%p2118_p4)
}
   0xd   :  { %s2211_s18 = smov 256   ;;  %s2212_s19 = smov 16  }
   0xe   :  { %37 = dma.hbm_to_vmem [thread:$0]  %s2598_s1, 12288, %s32_s16, [#allocation6], %s2211_s18, %s2211_s18, %s2212_s19  }
   0xf   :  { %s2213_s22 = smov [#allocation2]  }
  0x10   :  { %s19_s23 = sshll.u32 %s2213_s22, 4  ;;  %s20_s23 = int_to_ptr.vmem [resolvable:$true] %s19_s23 }
  0x11   :  { %s2130_s24 = scalar_lea.vmem %s20_s23, 3072  ;;  %p2135_p6 = scmp.lt.s32.totalorder %s20_s23, %s20_s23 }
  0x12   :  { %p2131_p5 = scmp.ne.s32.totalorder %s20_s23, %s2130_s24  ;;  %p2136_p7 = scmp.lt.s32.totalorder %s2130_s24, %s2130_s24 }
  0x14   :  { %p2137_p8 = por %p2136_p7, %p2135_p6 }
  0x16   :  { %p2138_p9 = pnand %p2137_p8, %p2131_p5 }
  0x18   :  { %2141 = shalt.err (!%p2138_p9)
}
  0x19   :  { %s2214_s25 = smov 192   ;;  %s2215_s26 = smov 12  }
  0x1a   :  { %25 = dma.hbm_to_vmem [thread:$0]  %s2597_s0, 3072, %s20_s23, [#allocation3], %s2214_s25, %s2214_s25, %s2215_s26  }
  0x1b   :  { %s2216_s29 = smov [#allocation7]  }
  0x1c   :  { %s43_s30 = sshll.u32 %s2216_s29, 4  ;;  %s44_s30 = int_to_ptr.vmem [resolvable:$true] %s43_s30 }
  0x1d   :  { %s2150_s1 = scalar_lea.vmem %s44_s30, 2048  ;;  %p2155_p11 = scmp.lt.s32.totalorder %s44_s30, %s44_s30 }
  0x1e   :  { %p2151_p10 = scmp.ne.s32.totalorder %s44_s30, %s2150_s1  ;;  %p2156_p12 = scmp.lt.s32.totalorder %s2150_s1, %s2150_s1 }
  0x20   :  { %p2157_p13 = por %p2156_p12, %p2155_p11 }
  0x22   :  { %p2158_p0 = pnand %p2157_p13, %p2151_p10 }
  0x24   :  { %2161 = shalt.err (!%p2158_p0)
}
  0x25   :  { %s2217_s5 = smov 512   ;;  %s2218_s6 = smov 32  }
  0x26   :  { %49 = dma.hbm_to_vmem [thread:$0]  %s2599_s2, 2048, %s44_s30, [#allocation6], %s2217_s5, %s2217_s5, %s2218_s6  }
  0x27   :  { %2202 = dma.done.wait [#allocation3], 3072  }
  0x28   :  { %2203 = vsyncadd [#allocation3], 4294964224 }
  0x29   :  { %2204 = dma.done.wait [#allocation6], 14336  }
  0x2a   :  { %2205 = vsyncadd [#allocation6], 4294952960  ;;  %v2219_v0 = vmov 0   ;;  %v1766_v1 = vld [vmem:[#allocation5 + $0xe4] ss:$16 sps:$4 sm:$0xff]   ;;  %s2220_s0 = smov [#allocation9]  }
  0x2b   :  { %941 = vmatprep.mubr.bf16.mxu1 %v2219_v0  ;;  %v1768_v2 = vld [vmem:[#allocation5 + $0x2e4] ss:$16 sps:$4 sm:$0xff]   ;;  %796 = vmatprep.subr.bf16.mxu0 %v1766_v1  ;;  %v1770_v3 = vld [vmem:[#allocation5 + $0xe0] ss:$16 sps:$4 sm:$0xff]   ;;  %v1819_v34 = vld [vmem:[#allocation5 + $0xec] ss:$16 sps:$4 sm:$0xff]  }
  0x2c   :  { %v1771_v4 = vld [vmem:[#allocation5 + $0x2e0] ss:$16 sps:$4 sm:$0xff]   ;;  %909 = vmatprep.subr.bf16.mxu1 %v1768_v2  ;;  %v1772_v5 = vld [vmem:[#allocation5 + $0xc4] ss:$16 sps:$4 sm:$0xff]   ;;  %797 = vmatpush1.bf16.msra.mxu0 %v1770_v3  ;;  %v1817_v36 = vld [vmem:[#allocation5 + $0xe8] ss:$16 sps:$4 sm:$0xff]  }
  0x2d   :  { %910 = vmatpush1.bf16.msra.mxu1 %v1771_v4  ;;  %v1774_v6 = vld [vmem:[#allocation5 + $0x2c4] ss:$16 sps:$4 sm:$0xff]   ;;  %v1776_v7 = vld [vmem:[#allocation5 + $0xc0] ss:$16 sps:$4 sm:$0xff]   ;;  %798 = vmatprep.subr.bf16.mxu0 %v1772_v5  ;;  %v1825_v39 = vld [vmem:[#allocation5 + $0xcc] ss:$16 sps:$4 sm:$0xff]  }
  0x2e   :  { %v1777_v8 = vld [vmem:[#allocation5 + $0x2c0] ss:$16 sps:$4 sm:$0xff]   ;;  %911 = vmatprep.subr.bf16.mxu1 %v1774_v6  ;;  %v1778_v9 = vld [vmem:[#allocation5 + $0xa4] ss:$16 sps:$4 sm:$0xff]   ;;  %v1823_v40 = vld [vmem:[#allocation5 + $0xc8] ss:$16 sps:$4 sm:$0xff]  }
  0x2f   :  { %v1780_v10 = vld [vmem:[#allocation5 + $0x2a4] ss:$16 sps:$4 sm:$0xff]   ;;  %v1782_v11 = vld [vmem:[#allocation5 + $0xa0] ss:$16 sps:$4 sm:$0xff]   ;;  %v1832_v43 = vld [vmem:[#allocation5 + $0xac] ss:$16 sps:$4 sm:$0xff]  }
  0x30   :  { %v1783_v12 = vld [vmem:[#allocation5 + $0x2a0] ss:$16 sps:$4 sm:$0xff]   ;;  %799 = vmatpush1.bf16.msra.mxu0 %v1776_v7  ;;  %v1784_v13 = vld [vmem:[#allocation5 + $0x84] ss:$16 sps:$4 sm:$0xff]   ;;  %v1830_v45 = vld [vmem:[#allocation5 + $0xa8] ss:$16 sps:$4 sm:$0xff]  }
  0x31   :  { %912 = vmatpush1.bf16.msra.mxu1 %v1777_v8  ;;  %800 = vmatprep.subr.bf16.mxu0 %v1778_v9  ;;  %v1786_v14 = vld [vmem:[#allocation5 + $0x284] ss:$16 sps:$4 sm:$0xff]   ;;  %v1788_v15 = vld [vmem:[#allocation5 + $0x80] ss:$16 sps:$4 sm:$0xff]   ;;  %v1838_v48 = vld [vmem:[#allocation5 + $0x8c] ss:$16 sps:$4 sm:$0xff]  }
  0x32   :  { %913 = vmatprep.subr.bf16.mxu1 %v1780_v10  ;;  %v1789_v16 = vld [vmem:[#allocation5 + $0x280] ss:$16 sps:$4 sm:$0xff]   ;;  %v1790_v17 = vld [vmem:[#allocation5 + $0x64] ss:$16 sps:$4 sm:$0xff]   ;;  %v1836_v49 = vld [vmem:[#allocation5 + $0x88] ss:$16 sps:$4 sm:$0xff]  }
  0x33   :  { %v1792_v18 = vld [vmem:[#allocation5 + $0x264] ss:$16 sps:$4 sm:$0xff]   ;;  %v1794_v19 = vld [vmem:[#allocation5 + $0x60] ss:$16 sps:$4 sm:$0xff]   ;;  %v1845_v52 = vld [vmem:[#allocation5 + $0x6c] ss:$16 sps:$4 sm:$0xff]  }
  0x34   :  { %801 = vmatpush1.bf16.msra.mxu0 %v1782_v11  ;;  %v1795_v20 = vld [vmem:[#allocation5 + $0x260] ss:$16 sps:$4 sm:$0xff]   ;;  %v1796_v21 = vld [vmem:[#allocation5 + $0x44] ss:$16 sps:$4 sm:$0xff]   ;;  %v1843_v54 = vld [vmem:[#allocation5 + $0x68] ss:$16 sps:$4 sm:$0xff]  }
  0x35   :  { %914 = vmatpush1.bf16.msra.mxu1 %v1783_v12  ;;  %802 = vmatprep.subr.bf16.mxu0 %v1784_v13  ;;  %v1798_v22 = vld [vmem:[#allocation5 + $0x244] ss:$16 sps:$4 sm:$0xff]   ;;  %v1800_v23 = vld [vmem:[#allocation5 + $0x40] ss:$16 sps:$4 sm:$0xff]   ;;  %v1851_v58 = vld [vmem:[#allocation5 + $0x4c] ss:$16 sps:$4 sm:$0xff]  }
  0x36   :  { %915 = vmatprep.subr.bf16.mxu1 %v1786_v14  ;;  %v1801_v24 = vld [vmem:[#allocation5 + $0x240] ss:$16 sps:$4 sm:$0xff]   ;;  %v1802_v25 = vld [vmem:[#allocation5 + $0x24] ss:$16 sps:$4 sm:$0xff]   ;;  %v1849_v59 = vld [vmem:[#allocation5 + $0x48] ss:$16 sps:$4 sm:$0xff]  }
  0x37   :  { %v1804_v26 = vld [vmem:[#allocation5 + $0x224] ss:$16 sps:$4 sm:$0xff]   ;;  %v1806_v27 = vld [vmem:[#allocation5 + $0x20] ss:$16 sps:$4 sm:$0xff]   ;;  %v1858_v62 = vld [vmem:[#allocation5 + $0x2c] ss:$16 sps:$4 sm:$0xff]  }
  0x38   :  { %803 = vmatpush1.bf16.msra.mxu0 %v1788_v15  ;;  %v1807_v28 = vld [vmem:[#allocation5 + $0x220] ss:$16 sps:$4 sm:$0xff]   ;;  %v1808_v29 = vld [vmem:[#allocation5 + $0x4] ss:$16 sps:$4 sm:$0xff]   ;;  %v1856_v1 = vld [vmem:[#allocation5 + $0x28] ss:$16 sps:$4 sm:$0xff]  }
  0x39   :  { %916 = vmatpush1.bf16.msra.mxu1 %v1789_v16  ;;  %804 = vmatprep.subr.bf16.mxu0 %v1790_v17  ;;  %v1810_v30 = vld [vmem:[#allocation5 + $0x204] ss:$16 sps:$4 sm:$0xff]   ;;  %v1812_v31 = vld [vmem:[#allocation5] ss:$16 sps:$4 sm:$0xff]   ;;  %v1864_v4 = vld [vmem:[#allocation5 + $0xc] ss:$16 sps:$4 sm:$0xff]  }
  0x3a   :  { %917 = vmatprep.subr.bf16.mxu1 %v1792_v18  ;;  %v1813_v32 = vld [vmem:[#allocation5 + $0x200] ss:$16 sps:$4 sm:$0xff]   ;;  %v1814_v33 = vld [vmem:[#allocation5 + $0x1e4] ss:$16 sps:$4 sm:$0xff]   ;;  %v1862_v5 = vld [vmem:[#allocation5 + $0x8] ss:$16 sps:$4 sm:$0xff]  }
  0x3b   :  { %v2260_v35 = vld [vmem:[#allocation2 + $0x8] ss:$12 sps:$4 sm:$0xff]   ;;  %v1820_v37 = vld [vmem:[#allocation5 + $0x1e0] ss:$16 sps:$4 sm:$0xff]   ;;  %v2268_v53 = vld [vmem:[#allocation2 + $0x38] ss:$12 sps:$4 sm:$0xff]  }
  0x3c   :  { %805 = vmatpush1.bf16.msra.mxu0 %v1794_v19  ;;  %v1821_v38 = vld [vmem:[#allocation5 + $0x1c4] ss:$16 sps:$4 sm:$0xff]   ;;  %v1826_v41 = vld [vmem:[#allocation5 + $0x1c0] ss:$16 sps:$4 sm:$0xff]   ;;  %v1872_v7 = vld [vmem:[#allocation5 + $0x1ec] ss:$16 sps:$4 sm:$0xff]  }
  0x3d   :  { %918 = vmatpush1.bf16.msra.mxu1 %v1795_v20  ;;  %806 = vmatprep.subr.bf16.mxu0 %v1796_v21  ;;  %v1827_v42 = vld [vmem:[#allocation5 + $0x1a4] ss:$16 sps:$4 sm:$0xff]   ;;  %v2264_v44 = vld [vmem:[#allocation2 + $0x20] ss:$12 sps:$4 sm:$0xff]   ;;  %v2275_v63 = vld [vmem:[#allocation2 + $0x50] ss:$12 sps:$4 sm:$0xff]  }
  0x3e   :  { %919 = vmatprep.subr.bf16.mxu1 %v1798_v22  ;;  %v1833_v46 = vld [vmem:[#allocation5 + $0x1a0] ss:$16 sps:$4 sm:$0xff]   ;;  %v1834_v47 = vld [vmem:[#allocation5 + $0x184] ss:$16 sps:$4 sm:$0xff]   ;;  %v2278_v8 = vld [vmem:[#allocation5 + $0x2ec] ss:$16 sps:$4 sm:$0xff]  }
  0x3f   :  { %v1839_v50 = vld [vmem:[#allocation5 + $0x180] ss:$16 sps:$4 sm:$0xff]   ;;  %v1840_v51 = vld [vmem:[#allocation5 + $0x164] ss:$16 sps:$4 sm:$0xff]   ;;  %v1870_v11 = vld [vmem:[#allocation5 + $0x1e8] ss:$16 sps:$4 sm:$0xff]  }
  0x40   :  { %807 = vmatpush1.bf16.msra.mxu0 %v1800_v23  ;;  %v1846_v55 = vld [vmem:[#allocation5 + $0x160] ss:$16 sps:$4 sm:$0xff]   ;;  %v1847_v57 = vld [vmem:[#allocation5 + $0x144] ss:$16 sps:$4 sm:$0xff]   ;;  %v2285_v12 = vld [vmem:[#allocation2 + $0x1c] ss:$12 sps:$4 sm:$0xff]  }
  0x41   :  { %920 = vmatpush1.bf16.msra.mxu1 %v1801_v24  ;;  %808 = vmatprep.subr.bf16.mxu0 %v1802_v25  ;;  %v2270_v56 = vld [vmem:[#allocation2 + $0x4] ss:$12 sps:$4 sm:$0xff]   ;;  %v2280_v9 = vld [vmem:[#allocation2] ss:$12 sps:$4 sm:$0xff]   ;;  %v2283_v10 = vld [vmem:[#allocation2 + $0x68] ss:$12 sps:$4 sm:$0xff]  }
  0x42   :  { %921 = vmatprep.subr.bf16.mxu1 %v1804_v26  ;;  %828 = vmatprep.mubr.bf16.mxu0 %v2270_v56  ;;  %v1852_v60 = vld [vmem:[#allocation5 + $0x140] ss:$16 sps:$4 sm:$0xff]   ;;  %v1853_v61 = vld [vmem:[#allocation5 + $0x124] ss:$16 sps:$4 sm:$0xff]   ;;  %v1875_v13 = vld [vmem:[#allocation5 + $0x1cc] ss:$16 sps:$4 sm:$0xff]  }
  0x43   :  { %v1859_v2 = vld [vmem:[#allocation5 + $0x120] ss:$16 sps:$4 sm:$0xff]   ;;  %v1860_v3 = vld [vmem:[#allocation5 + $0x104] ss:$16 sps:$4 sm:$0xff]   ;;  %v2288_v14 = vld [vmem:[#allocation5 + $0x2e8] ss:$16 sps:$4 sm:$0xff]  }
  0x44   :  { %809 = vmatpush1.bf16.msra.mxu0 %v1806_v27  ;;  %v1865_v6 = vld [vmem:[#allocation5 + $0x100] ss:$16 sps:$4 sm:$0xff]   ;;  %v2292_v15 = vld [vmem:[#allocation5 + $0x2cc] ss:$16 sps:$4 sm:$0xff]   ;;  %v1873_v16 = vld [vmem:[#allocation5 + $0x1c8] ss:$16 sps:$4 sm:$0xff]  }
  0x45   :  { %922 = vmatpush1.bf16.msra.mxu1 %v1807_v28  ;;  %810 = vmatprep.subr.bf16.mxu0 %v1808_v29  ;;  %v1882_v17 = vld [vmem:[#allocation5 + $0x1ac] ss:$16 sps:$4 sm:$0xff]   ;;  %v2296_v18 = vld [vmem:[#allocation2 + $0x18] ss:$12 sps:$4 sm:$0xff]   ;;  %v2304_v22 = vld [vmem:[#allocation2 + $0x34] ss:$12 sps:$4 sm:$0xff]  }
  0x46   :  { %923 = vmatprep.subr.bf16.mxu1 %v1810_v30  ;;  %v2299_v19 = vld [vmem:[#allocation5 + $0x2c8] ss:$16 sps:$4 sm:$0xff]   ;;  %v2301_v20 = vld [vmem:[#allocation2 + $0x80] ss:$12 sps:$4 sm:$0xff]   ;;  %v2317_v29 = vld [vmem:[#allocation2 + $0x30] ss:$12 sps:$4 sm:$0xff]  }
  0x47   :  { %v1880_v21 = vld [vmem:[#allocation5 + $0x1a8] ss:$16 sps:$4 sm:$0xff]   ;;  %v1888_v23 = vld [vmem:[#allocation5 + $0x18c] ss:$16 sps:$4 sm:$0xff]   ;;  %s1601_s2 = sshll.u32 %s2220_s0, 4  ;;  %s1602_s2 = int_to_ptr.vmem [resolvable:$true] %s1601_s2 }
  0x48   :  { %811 = vmatpush1.bf16.msra.mxu0 %v1812_v31  ;;  %v2307_v24 = vld [vmem:[#allocation5 + $0x2ac] ss:$16 sps:$4 sm:$0xff]   ;;  %v1886_v25 = vld [vmem:[#allocation5 + $0x188] ss:$16 sps:$4 sm:$0xff]   ;;  %s2162_s9 = scalar_lea.vmem %s1602_s2, 2048  ;;  %p2167_p2 = scmp.lt.s32.totalorder %s1602_s2, %s1602_s2 }
  0x49   :  { %924 = vmatpush1.bf16.msra.mxu1 %v1813_v32  ;;  %812 = vmatprep.subr.bf16.mxu0 %v1814_v33  ;;  %v2311_v26 = vld [vmem:[#allocation5 + $0x2a8] ss:$16 sps:$4 sm:$0xff]   ;;  %v2314_v27 = vld [vmem:[#allocation5 + $0x28c] ss:$16 sps:$4 sm:$0xff]   ;;  %p2163_p1 = scmp.ne.s32.totalorder %s1602_s2, %s2162_s9  ;;  %p2168_p3 = scmp.lt.s32.totalorder %s2162_s9, %s2162_s9 }
  0x4a   :  { %1022 = vmatprep.subr.bf16.mxu1 %v1819_v34  ;;  %v1895_v28 = vld [vmem:[#allocation5 + $0x16c] ss:$16 sps:$4 sm:$0xff]   ;;  %v2320_v30 = vld [vmem:[#allocation2 + $0x98] ss:$12 sps:$4 sm:$0xff]  }
  0x4b   :  { %v1893_v31 = vld [vmem:[#allocation5 + $0x168] ss:$16 sps:$4 sm:$0xff]   ;;  %v1901_v33 = vld [vmem:[#allocation5 + $0x14c] ss:$16 sps:$4 sm:$0xff]   ;;  %p2169_p4 = por %p2168_p3, %p2167_p2 }
  0x4c   :  { %942 = vmatmul.mubr.bf16.vlgmr.msra.gmra.mxu1 %v2260_v35  ;;  %813 = vmatpush2.bf16.msra.mxu0 %v1820_v37  ;;  %v2323_v32 = vld [vmem:[#allocation2 + $0x4c] ss:$12 sps:$4 sm:$0xff]  }
  0x4d   :  { %1023 = vmatpush1.bf16.msra.mxu1 %v1817_v36  ;;  %814 = vmatprep.subr.bf16.mxu0 %v1821_v38  ;;  %v1918_v34 = vld [vmem:[#allocation5 + $0x288] ss:$16 sps:$4 sm:$0xff]   ;;  %v1926_v36 = vld [vmem:[#allocation5 + $0x26c] ss:$16 sps:$4 sm:$0xff]   ;;  %p2170_p5 = pnand %p2169_p4, %p2163_p1 }
  0x4e   :  { %1024 = vmatprep.subr.bf16.mxu1 %v1825_v39  ;;  %951 = vmatprep.mubr.bf16.mxu1 %v2219_v0  ;;  %v1899_v37 = vld [vmem:[#allocation5 + $0x148] ss:$16 sps:$4 sm:$0xff]   ;;  %v1908_v38 = vld [vmem:[#allocation5 + $0x12c] ss:$16 sps:$4 sm:$0xff]  }
  0x4f   :  { %v1924_v39 = vld [vmem:[#allocation5 + $0x268] ss:$16 sps:$4 sm:$0xff]  }
  0x50   :  { %815 = vmatpush2.bf16.msra.mxu0 %v1826_v41  ;;  %v2330_v41 = vld [vmem:[#allocation2 + $0xb0] ss:$12 sps:$4 sm:$0xff]  }
  0x51   :  { %1025 = vmatpush1.bf16.msra.mxu1 %v1823_v40  ;;  %816 = vmatprep.subr.bf16.mxu0 %v1827_v42  ;;  %v1904_v40 = vld [vmem:[#allocation2 + $0x48] ss:$12 sps:$4 sm:$0xff]  }
  0x52   :  { %1026 = vmatprep.subr.bf16.mxu1 %v1832_v43  ;;  %v1906_v42 = vld [vmem:[#allocation5 + $0x128] ss:$16 sps:$4 sm:$0xff]   ;;  %v1915_v43 = vld [vmem:[#allocation2 + $0x64] ss:$12 sps:$4 sm:$0xff]  }
  0x54   :  { %952 = vmatmul.mubr.bf16.gmra.mxu1 %v2264_v44  ;;  %817 = vmatpush2.bf16.msra.mxu0 %v1833_v46  ;;  %v1932_v46 = vld [vmem:[#allocation5 + $0x24c] ss:$16 sps:$4 sm:$0xff]  }
  0x55   :  { %1027 = vmatpush1.bf16.msra.mxu1 %v1830_v45  ;;  %818 = vmatprep.subr.bf16.mxu0 %v1834_v47  ;;  %v1914_v45 = vld [vmem:[#allocation5 + $0x10c] ss:$16 sps:$4 sm:$0xff]   ;;  %v1930_v47 = vld [vmem:[#allocation5 + $0x248] ss:$16 sps:$4 sm:$0xff]  }
  0x56   :  { %1028 = vmatprep.subr.bf16.mxu1 %v1838_v48  ;;  %961 = vmatprep.mubr.bf16.mxu1 %v2219_v0  ;;  %v1912_v48 = vld [vmem:[#allocation5 + $0x108] ss:$16 sps:$4 sm:$0xff]  }
  0x58   :  { %819 = vmatpush2.bf16.msra.mxu0 %v1839_v50  ;;  %v1917_v50 = vld [vmem:[#allocation2 + $0x60] ss:$12 sps:$4 sm:$0xff]  }
  0x59   :  { %1029 = vmatpush1.bf16.msra.mxu1 %v1836_v49  ;;  %820 = vmatprep.subr.bf16.mxu0 %v1840_v51  ;;  %v1938_v49 = vld [vmem:[#allocation5 + $0x22c] ss:$16 sps:$4 sm:$0xff]  }
  0x5a   :  { %1030 = vmatprep.subr.bf16.mxu1 %v1845_v52  ;;  %v1921_v51 = vld [vmem:[#allocation2 + $0x7c] ss:$12 sps:$4 sm:$0xff]  }
  0x5b   :  { %v1936_v52 = vld [vmem:[#allocation5 + $0x228] ss:$16 sps:$4 sm:$0xff]  }
  0x5c   :  { %962 = vmatmul.mubr.bf16.gmra.mxu1 %v2268_v53  ;;  %821 = vmatpush2.bf16.msra.mxu0 %v1846_v55  ;;  %v1939_v55 = vld [vmem:[#allocation5 + $0x208] ss:$16 sps:$4 sm:$0xff]  }
  0x5d   :  { %1031 = vmatpush1.bf16.msra.mxu1 %v1843_v54  ;;  %822 = vmatprep.subr.bf16.mxu0 %v1847_v57  ;;  %v1941_v54 = vld [vmem:[#allocation5 + $0x20c] ss:$16 sps:$4 sm:$0xff]   ;;  %v1927_v57 = vld [vmem:[#allocation2 + $0x94] ss:$12 sps:$4 sm:$0xff]  }
  0x5e   :  { %1032 = vmatprep.subr.bf16.mxu1 %v1851_v58  ;;  %971 = vmatprep.mubr.bf16.mxu1 %v2219_v0  ;;  %v1929_v58 = vld [vmem:[#allocation2 + $0x90] ss:$12 sps:$4 sm:$0xff]  }
  0x60   :  { %823 = vmatpush2.bf16.msra.mxu0 %v1852_v60  ;;  %v1935_v60 = vld [vmem:[#allocation2 + $0xa8] ss:$12 sps:$4 sm:$0xff]  }
  0x61   :  { %1033 = vmatpush1.bf16.msra.mxu1 %v1849_v59  ;;  %824 = vmatprep.subr.bf16.mxu0 %v1853_v61  ;;  %v1933_v59 = vld [vmem:[#allocation2 + $0xac] ss:$12 sps:$4 sm:$0xff]  }
  0x62   :  { %1034 = vmatprep.subr.bf16.mxu1 %v1858_v62 }
  0x64   :  { %972 = vmatmul.mubr.bf16.gmra.mxu1 %v2275_v63  ;;  %825 = vmatpush2.bf16.msra.mxu0 %v1859_v2 }
  0x65   :  { %1035 = vmatpush1.bf16.msra.mxu1 %v1856_v1  ;;  %826 = vmatprep.subr.bf16.mxu0 %v1860_v3 }
  0x66   :  { %1036 = vmatprep.subr.bf16.mxu1 %v1864_v4  ;;  %981 = vmatprep.mubr.bf16.mxu1 %v2219_v0 }
  0x68   :  { %827 = vmatpush2.bf16.msra.mxu0 %v1865_v6 }
  0x69   :  { %1037 = vmatpush1.bf16.msra.mxu1 %v1862_v5  ;;  %1135 = vmatprep.subr.bf16.mxu0 %v2278_v8 }
  0x6a   :  { %1038 = vmatprep.subr.bf16.mxu1 %v1872_v7 }
  0x6b   :  { %829 = vmatmul.mubr.bf16.vlgmr.msra.gmra.mxu0 %v2280_v9 }
  0x6c   :  { %982 = vmatmul.mubr.bf16.gmra.mxu1 %v2283_v10  ;;  %838 = vmatprep.mubr.bf16.mxu0 %v2285_v12 }
  0x6d   :  { %1039 = vmatpush2.bf16.msra.mxu1 %v1870_v11  ;;  %991 = vmatprep.mubr.bf16.mxu1 %v2219_v0 }
  0x6e   :  { %1040 = vmatprep.subr.bf16.mxu1 %v1875_v13  ;;  %1136 = vmatpush1.bf16.msra.mxu0 %v2288_v14 }
  0x6f   :  { %1137 = vmatprep.subr.bf16.mxu0 %v2292_v15 }
  0x71   :  { %1041 = vmatpush2.bf16.msra.mxu1 %v1873_v16 }
  0x72   :  { %1042 = vmatprep.subr.bf16.mxu1 %v1882_v17  ;;  %1138 = vmatpush1.bf16.msra.mxu0 %v2299_v19 }
  0x73   :  { %839 = vmatmul.mubr.bf16.gmra.mxu0 %v2296_v18  ;;  %1139 = vmatprep.subr.bf16.mxu0 %v2307_v24 }
  0x74   :  { %992 = vmatmul.mubr.bf16.gmra.mxu1 %v2301_v20  ;;  %848 = vmatprep.mubr.bf16.mxu0 %v2304_v22 }
  0x75   :  { %1043 = vmatpush2.bf16.msra.mxu1 %v1880_v21  ;;  %1001 = vmatprep.mubr.bf16.mxu1 %v2219_v0 }
  0x76   :  { %1044 = vmatprep.subr.bf16.mxu1 %v1888_v23  ;;  %1140 = vmatpush1.bf16.msra.mxu0 %v2311_v26 }
  0x77   :  { %1141 = vmatprep.subr.bf16.mxu0 %v2314_v27 }
  0x79   :  { %1045 = vmatpush2.bf16.msra.mxu1 %v1886_v25 }
  0x7a   :  { %1046 = vmatprep.subr.bf16.mxu1 %v1895_v28  ;;  %1142 = vmatpush1.bf16.msra.mxu0 %v1918_v34 }
  0x7b   :  { %849 = vmatmul.mubr.bf16.gmra.mxu0 %v2317_v29  ;;  %1143 = vmatprep.subr.bf16.mxu0 %v1926_v36 }
  0x7c   :  { %1002 = vmatmul.mubr.bf16.gmra.mxu1 %v2320_v30  ;;  %858 = vmatprep.mubr.bf16.mxu0 %v2323_v32 }
  0x7d   :  { %1047 = vmatpush2.bf16.msra.mxu1 %v1893_v31  ;;  %1011 = vmatprep.mubr.bf16.mxu1 %v2219_v0 }
  0x7e   :  { %1048 = vmatprep.subr.bf16.mxu1 %v1901_v33  ;;  %1144 = vmatpush1.bf16.msra.mxu0 %v1924_v39 }
  0x7f   :  { %1145 = vmatprep.subr.bf16.mxu0 %v1932_v46 }
  0x81   :  { %1049 = vmatpush2.bf16.msra.mxu1 %v1899_v37 }
  0x82   :  { %1050 = vmatprep.subr.bf16.mxu1 %v1908_v38  ;;  %1146 = vmatpush1.bf16.msra.mxu0 %v1930_v47 }
  0x83   :  { %859 = vmatmul.mubr.bf16.gmra.mxu0 %v1904_v40  ;;  %1147 = vmatprep.subr.bf16.mxu0 %v1938_v49 }
  0x84   :  { %1012 = vmatmul.mubr.bf16.gmra.mxu1 %v2330_v41  ;;  %868 = vmatprep.mubr.bf16.mxu0 %v1915_v43 }
  0x85   :  { %1051 = vmatpush2.bf16.msra.mxu1 %v1906_v42  ;;  %1054 = vmatprep.mubr.bf16.mxu1 %v2270_v56  ;;  %v1923_v56 = vld [vmem:[#allocation2 + $0x78] ss:$12 sps:$4 sm:$0xff]  }
  0x86   :  { %1052 = vmatprep.subr.bf16.mxu1 %v1914_v45  ;;  %1148 = vmatpush1.bf16.msra.mxu0 %v1936_v52 }
  0x87   :  { %1149 = vmatprep.subr.bf16.mxu0 %v1941_v54 }
  0x89   :  { %1053 = vmatpush2.bf16.msra.mxu1 %v1912_v48 }
  0x8a   :  { %1738 = vmatprep.subr.bf16.mxu1 %v2278_v8  ;;  %1150 = vmatpush1.bf16.msra.mxu0 %v1939_v55 }
  0x8b   :  { %869 = vmatmul.mubr.bf16.gmra.mxu0 %v1917_v50 }
  0x8c   :  { %1055 = vmatmul.mubr.bf16.vlgmr.msra.gmra.mxu1 %v2280_v9  ;;  %878 = vmatprep.mubr.bf16.mxu0 %v1921_v51 }
  0x8d   :  { %1746 = vmatpush1.bf16.msra.mxu1 %v2288_v14  ;;  %1064 = vmatprep.mubr.bf16.mxu1 %v2285_v12 }
  0x8e   :  { %1739 = vmatprep.subr.bf16.mxu1 %v2292_v15 }
  0x91   :  { %1747 = vmatpush1.bf16.msra.mxu1 %v2299_v19 }
  0x92   :  { %1740 = vmatprep.subr.bf16.mxu1 %v2307_v24 }
  0x93   :  { %879 = vmatmul.mubr.bf16.gmra.mxu0 %v1923_v56 }
  0x94   :  { %1065 = vmatmul.mubr.bf16.gmra.mxu1 %v2296_v18  ;;  %888 = vmatprep.mubr.bf16.mxu0 %v1927_v57 }
  0x95   :  { %1074 = vmatprep.mubr.bf16.mxu1 %v2304_v22  ;;  %1748 = vmatpush1.bf16.msra.mxu1 %v2311_v26 }
  0x96   :  { %1741 = vmatprep.subr.bf16.mxu1 %v2314_v27 }
  0x99   :  { %1749 = vmatpush1.bf16.msra.mxu1 %v1918_v34 }
  0x9a   :  { %1742 = vmatprep.subr.bf16.mxu1 %v1926_v36 }
  0x9b   :  { %889 = vmatmul.mubr.bf16.gmra.mxu0 %v1929_v58 }
  0x9c   :  { %1075 = vmatmul.mubr.bf16.gmra.mxu1 %v2317_v29  ;;  %898 = vmatprep.mubr.bf16.mxu0 %v1933_v59 }
  0x9d   :  { %1084 = vmatprep.mubr.bf16.mxu1 %v2323_v32  ;;  %1750 = vmatpush1.bf16.msra.mxu1 %v1924_v39 }
  0x9e   :  { %1743 = vmatprep.subr.bf16.mxu1 %v1932_v46 }
  0xa1   :  { %1751 = vmatpush1.bf16.msra.mxu1 %v1930_v47 }
  0xa2   :  { %1744 = vmatprep.subr.bf16.mxu1 %v1938_v49 }
  0xa3   :  { %899 = vmatmul.mubr.bf16.gmra.mxu0 %v1935_v60 }
  0xa4   :  { %1085 = vmatmul.mubr.bf16.gmra.mxu1 %v1904_v40  ;;  %1167 = vmatprep.mubr.bf16.mxu0 %v2219_v0 }
  0xa5   :  { %1094 = vmatprep.mubr.bf16.mxu1 %v1915_v43  ;;  %1752 = vmatpush1.bf16.msra.mxu1 %v1936_v52 }
  0xa6   :  { %1745 = vmatprep.subr.bf16.mxu1 %v1941_v54 }
  0xa9   :  { %1753 = vmatpush1.bf16.msra.mxu1 %v1939_v55 }
  0xab   :  { %1168 = vmatmul.mubr.bf16.vlgmr.msra.gmra.mxu0 %v2260_v35 }
  0xac   :  { %1095 = vmatmul.mubr.bf16.gmra.mxu1 %v1917_v50  ;;  %1177 = vmatprep.mubr.bf16.mxu0 %v2219_v0 }
  0xad   :  { %1104 = vmatprep.mubr.bf16.mxu1 %v1921_v51 }
  0xb3   :  { %1178 = vmatmul.mubr.bf16.gmra.mxu0 %v2264_v44 }
  0xb4   :  { %1105 = vmatmul.mubr.bf16.gmra.mxu1 %v1923_v56  ;;  %1187 = vmatprep.mubr.bf16.mxu0 %v2219_v0 }
  0xb5   :  { %1114 = vmatprep.mubr.bf16.mxu1 %v1927_v57 }
  0xbb   :  { %1188 = vmatmul.mubr.bf16.gmra.mxu0 %v2268_v53 }
  0xbc   :  { %1115 = vmatmul.mubr.bf16.gmra.mxu1 %v1929_v58  ;;  %1197 = vmatprep.mubr.bf16.mxu0 %v2219_v0 }
  0xbd   :  { %1124 = vmatprep.mubr.bf16.mxu1 %v1933_v59 }
  0xc3   :  { %1198 = vmatmul.mubr.bf16.gmra.mxu0 %v2275_v63 }
  0xc4   :  { %1125 = vmatmul.mubr.bf16.gmra.mxu1 %v1935_v60  ;;  %1207 = vmatprep.mubr.bf16.mxu0 %v2219_v0 }
  0xc5   :  { %1227 = vmatprep.mubr.bf16.mxu1 %v2219_v0 }
  0xcb   :  { %1208 = vmatmul.mubr.bf16.gmra.mxu0 %v2283_v10 }
  0xcc   :  { %1228 = vmatmul.mubr.bf16.vlgmr.msra.gmra.mxu1 %v2320_v30  ;;  %1217 = vmatprep.mubr.bf16.mxu0 %v2219_v0 }
  0xcd   :  { %1237 = vmatprep.mubr.bf16.mxu1 %v2219_v0 }
  0xd3   :  { %1218 = vmatmul.mubr.bf16.gmra.mxu0 %v2301_v20 }
  0xd4   :  { %1238 = vmatmul.mubr.bf16.gmra.mxu1 %v2330_v41 }
 0x10c   :  { %v943_v35 = vpop.f32.mrf.mxu1 }
 0x10e   :  { %v945_v44 = vpop.f32.mrf.mxu1 }
 0x110   :  { %v947_v53 = vpop.f32.mrf.mxu1 }
 0x112   :  { %v949_v61 = vpop.f32.mrf.mxu1 }
 0x114   :  { %v953_v62 = vpop.f32.mrf.mxu1 }
 0x116   :  { %v955_v63 = vpop.f32.mrf.mxu1 }
 0x118   :  { %v2363_v1 = vpop.f32.mrf.mxu1 }
 0x11a   :  { %v2365_v2 = vpop.f32.mrf.mxu1 }
 0x11c   :  { %v963_v3 = vpop.f32.mrf.mxu1 }
 0x11e   :  { %v965_v4 = vpop.f32.mrf.mxu1 }
 0x120   :  { %v967_v5 = vpop.f32.mrf.mxu1 }
 0x122   :  { %v969_v6 = vpop.f32.mrf.mxu1 }
 0x124   :  { %v2367_v7 = vpop.f32.mrf.mxu1 }
 0x126   :  { %v2369_v0 = vpop.f32.mrf.mxu1 }
 0x128   :  { %v2371_v8 = vpop.f32.mrf.mxu1 }
 0x12a   :  { %v2373_v9 = vpop.f32.mrf.mxu1 }
 0x12b   :  { %v830_v10 = vpop.f32.mrf.mxu0 }
 0x12c   :  { %v2375_v11 = vpop.f32.mrf.mxu1  ;;  %v944_v39 = vadd.f32 %v943_v35, %v830_v10 }
 0x12d   :  { %v832_v12 = vpop.f32.mrf.mxu0 }
 0x12e   :  { %v2377_v13 = vpop.f32.mrf.mxu1  ;;  %v946_v42 = vadd.f32 %v945_v44, %v832_v12  ;;  %v1248_v47 = vmul.f32 0.5, %v944_v39 }
 0x12f   :  { %v834_v14 = vpop.f32.mrf.mxu0 }
 0x130   :  { %v2379_v15 = vpop.f32.mrf.mxu1  ;;  %v948_v46 = vadd.f32 %v947_v53, %v834_v14  ;;  %v1249_v51 = vmul.f32 0.5, %v946_v42  ;;  %1942 = vtanh.f32 %v1248_v47 }
 0x131   :  { %v836_v16 = vpop.f32.mrf.mxu0 }
 0x132   :  { %v2381_v17 = vpop.f32.mrf.mxu1  ;;  %v950_v48 = vadd.f32 %v949_v61, %v836_v16  ;;  %v1252_v57 = vmul.f32 0.5, %v948_v46  ;;  %1944 = vtanh.f32 %v1249_v51 }
 0x133   :  { %v840_v18 = vpop.f32.mrf.mxu0 }
 0x134   :  { %v2383_v19 = vpop.f32.mrf.mxu1  ;;  %v954_v54 = vadd.f32 %v953_v62, %v840_v18  ;;  %v1253_v59 = vmul.f32 0.5, %v950_v48  ;;  %1946 = vtanh.f32 %v1252_v57 }
 0x135   :  { %v842_v20 = vpop.f32.mrf.mxu0 }
 0x136   :  { %v2385_v21 = vpop.f32.mrf.mxu1  ;;  %v956_v60 = vadd.f32 %v955_v63, %v842_v20  ;;  %v1256_v10 = vmul.f32 0.5, %v954_v54  ;;  %1948 = vtanh.f32 %v1253_v59 }
 0x137   :  { %v844_v22 = vpop.f32.mrf.mxu0 }
 0x138   :  { %v2387_v23 = vpop.f32.mrf.mxu1  ;;  %v958_v14 = vadd.f32 %v2363_v1, %v844_v22  ;;  %v1257_v16 = vmul.f32 0.5, %v956_v60 }
 0x139   :  { %v846_v24 = vpop.f32.mrf.mxu0 }
 0x13a   :  { %v2389_v25 = vpop.f32.mrf.mxu1  ;;  %v1260_v22 = vmul.f32 0.5, %v958_v14 }
 0x13b   :  { %v850_v26 = vpop.f32.mrf.mxu0 }
 0x13c   :  { %v2391_v27 = vpop.f32.mrf.mxu1  ;;  %v964_v52 = vadd.f32 %v963_v3, %v850_v26 }
 0x13d   :  { %v852_v28 = vpop.f32.mrf.mxu0  ;;  %v1943_v47 = vpop.eup %1942 }
 0x13e   :  { %v2393_v29 = vpop.f32.mrf.mxu1  ;;  %v966_v58 = vadd.f32 %v965_v4, %v852_v28  ;;  %v1344_v53 = vmul.f32 0.5, %v964_v52  ;;  %v1280_v59 = vmul.f32 0.5, %v1943_v47 }
 0x13f   :  { %v854_v30 = vpop.f32.mrf.mxu0  ;;  %v1945_v51 = vpop.eup %1944 }
 0x140   :  { %v2395_v31 = vpop.f32.mrf.mxu1  ;;  %v968_v61 = vadd.f32 %v967_v5, %v854_v30  ;;  %v1345_v4 = vmul.f32 0.5, %v966_v58  ;;  %v960_v5 = vadd.f32 %v2365_v2, %v846_v24  ;;  %1950 = vtanh.f32 %v1344_v53 }
 0x141   :  { %v856_v32 = vpop.f32.mrf.mxu0  ;;  %1952 = vtanh.f32 %v1256_v10  ;;  %v1947_v58 = vpop.eup %1946  ;;  %v1281_v10 = vmul.f32 0.5, %v1945_v51 }
 0x142   :  { %v2397_v33 = vpop.f32.mrf.mxu1  ;;  %v970_v12 = vadd.f32 %v969_v6, %v856_v32  ;;  %v1348_v6 = vmul.f32 0.5, %v968_v61  ;;  %1954 = vtanh.f32 %v1345_v4  ;;  %v1261_v2 = vmul.f32 0.5, %v960_v5 }
 0x143   :  { %v860_v34 = vpop.f32.mrf.mxu0  ;;  %1956 = vtanh.f32 %v1257_v16  ;;  %v1284_v5 = vmul.f32 0.5, %v1947_v58 }
 0x144   :  { %v2399_v36 = vpop.f32.mrf.mxu1  ;;  %v974_v63 = vadd.f32 %v2367_v7, %v860_v34  ;;  %v1349_v26 = vmul.f32 0.5, %v970_v12  ;;  %1958 = vtanh.f32 %v1348_v6 }
 0x145   :  { %v862_v37 = vpop.f32.mrf.mxu0  ;;  %v1300_v51 = vadd.f32 0.5, %v1284_v5 }
 0x146   :  { %v2401_v38 = vpop.f32.mrf.mxu1  ;;  %v976_v28 = vadd.f32 %v2369_v0, %v862_v37  ;;  %v1352_v32 = vmul.f32 0.5, %v974_v63  ;;  %1960 = vtanh.f32 %v1349_v26  ;;  %v2460_v63 = vadd.f32 0.5, %v1280_v59 }
 0x147   :  { %v864_v40 = vpop.f32.mrf.mxu0  ;;  %1962 = vtanh.f32 %v1260_v22 }
 0x148   :  { %v2403_v41 = vpop.f32.mrf.mxu1  ;;  %v978_v7 = vadd.f32 %v2371_v8, %v864_v40  ;;  %v1353_v24 = vmul.f32 0.5, %v976_v28  ;;  %1964 = vtanh.f32 %v1352_v32 }
 0x149   :  { %v866_v43 = vpop.f32.mrf.mxu0  ;;  %1966 = vtanh.f32 %v1261_v2 }
 0x14a   :  { %v2405_v45 = vpop.f32.mrf.mxu1  ;;  %v980_v0 = vadd.f32 %v2373_v9, %v866_v43  ;;  %v1356_v46 = vmul.f32 0.5, %v978_v7  ;;  %1968 = vtanh.f32 %v1353_v24 }
 0x14b   :  { %v870_v49 = vpop.f32.mrf.mxu0 }
 0x14c   :  { %v2407_v50 = vpop.f32.mrf.mxu1  ;;  %v1357_v52 = vmul.f32 0.5, %v980_v0  ;;  %v984_v54 = vadd.f32 %v2375_v11, %v870_v49  ;;  %1970 = vtanh.f32 %v1356_v46 }
 0x14d   :  { %v2409_v55 = vpop.f32.mrf.mxu0 }
 0x14e   :  { %v2411_v56 = vpop.f32.mrf.mxu1  ;;  %v986_v60 = vadd.f32 %v2377_v13, %v2409_v55  ;;  %v1472_v12 = vmul.f32 0.5, %v984_v54 }
 0x14f   :  { %v2413_v35 = vpop.f32.mrf.mxu0 }
 0x150   :  { %v2415_v44 = vpop.f32.mrf.mxu1  ;;  %v1473_v6 = vmul.f32 0.5, %v986_v60 }
 0x151   :  { %v2417_v3 = vpop.f32.mrf.mxu0 }
 0x152   :  { %v2419_v62 = vpop.f32.mrf.mxu1 }
 0x153   :  { %v2423_v18 = vpop.f32.mrf.mxu0 }
 0x154   :  { %v2425_v20 = vpop.f32.mrf.mxu1  ;;  %v994_v24 = vadd.f32 %v2383_v19, %v2423_v18 }
 0x155   :  { %v2429_v30 = vpop.f32.mrf.mxu0 }
 0x156   :  { %v2431_v1 = vpop.f32.mrf.mxu1 }
 0x157   :  { %v2434_v34 = vpop.f32.mrf.mxu0 }
 0x158   :  { %v2436_v39 = vpop.f32.mrf.mxu1 }
 0x159   :  { %v2439_v37 = vpop.f32.mrf.mxu0 }
 0x15a   :  { %v2441_v42 = vpop.f32.mrf.mxu1 }
 0x15b   :  { %v890_v8 = vpop.f32.mrf.mxu0 }
 0x15c   :  { %v2443_v40 = vpop.f32.mrf.mxu1  ;;  %v1004_v48 = vadd.f32 %v2391_v27, %v890_v8  ;;  %v1949_v27 = vpop.eup %1948 }
 0x15d   :  { %v892_v9 = vpop.f32.mrf.mxu0  ;;  %v1951_v49 = vpop.eup %1950 }
 0x15e   :  { %v2447_v43 = vpop.f32.mrf.mxu1  ;;  %v1006_v57 = vadd.f32 %v2393_v29, %v892_v9  ;;  %1972 = vtanh.f32 %v1004_v48  ;;  %v988_v29 = vadd.f32 %v2379_v15, %v2413_v35  ;;  %v1953_v16 = vpop.eup %1952  ;;  %v2466_v15 = vadd.f32 0.5, %v1281_v10 }
 0x15f   :  { %v894_v53 = vpop.f32.mrf.mxu0  ;;  %v1955_v55 = vpop.eup %1954  ;;  %v1376_v35 = vmul.f32 0.5, %v1951_v49 }
 0x160   :  { %v2452_v61 = vpop.f32.mrf.mxu1  ;;  %1974 = vtanh.f32 %v1006_v57  ;;  %v1008_v11 = vadd.f32 %v2395_v31, %v894_v53  ;;  %v990_v31 = vadd.f32 %v2381_v17, %v2417_v3  ;;  %v1957_v22 = vpop.eup %1956  ;;  %v1476_v2 = vmul.f32 0.5, %v988_v29 }
 0x161   :  { %1976 = vtanh.f32 %v1357_v52  ;;  %v896_v14 = vpop.f32.mrf.mxu0  ;;  %v1959_v32 = vpop.eup %1958  ;;  %v1288_v3 = vmul.f32 0.5, %v1953_v16  ;;  %v1377_v8 = vmul.f32 0.5, %v1955_v55  ;;  %v996_v52 = vadd.f32 %v2385_v21, %v2429_v30 }
 0x162   :  { %v2457_v4 = vpop.f32.mrf.mxu1  ;;  %1978 = vtanh.f32 %v1008_v11  ;;  %v1010_v13 = vadd.f32 %v2397_v33, %v896_v14  ;;  %v1285_v33 = vmul.f32 0.5, %v1949_v27  ;;  %v1961_v17 = vpop.eup %1960  ;;  %v1392_v18 = vadd.f32 0.5, %v1376_v35 }
 0x163   :  { %v900_v26 = vpop.f32.mrf.mxu0  ;;  %v1963_v48 = vpop.eup %1962  ;;  %v1380_v57 = vmul.f32 0.5, %v1959_v32  ;;  %v1381_v53 = vmul.f32 0.5, %v1961_v17  ;;  %v1480_v27 = vmul.f32 0.5, %v994_v24  ;;  %v2485_v30 = vadd.f32 0.5, %v1288_v3  ;;  %v1412_v32 = vld [vmem:[#allocation7 + $0x20] sm:$0xff] }
 0x164   :  { %v2464_v28 = vpop.f32.mrf.mxu1  ;;  %1980 = vtanh.f32 %v1010_v13  ;;  %v1014_v7 = vadd.f32 %v2399_v36, %v900_v26  ;;  %v1477_v36 = vmul.f32 0.5, %v990_v31  ;;  %v1965_v19 = vpop.eup %1964  ;;  %v2481_v60 = vadd.f32 0.5, %v1285_v33 }
 0x165   :  { %1982 = vtanh.f32 %v1472_v12  ;;  %v902_v0 = vpop.f32.mrf.mxu0  ;;  %v2479_v59 = vpop.eup %1966  ;;  %v1393_v49 = vadd.f32 0.5, %v1377_v8  ;;  %v1384_v14 = vmul.f32 0.5, %v1965_v19  ;;  %v1481_v16 = vmul.f32 0.5, %v996_v52 }
 0x166   :  { %v2471_v46 = vpop.f32.mrf.mxu1  ;;  %1984 = vtanh.f32 %v1014_v7  ;;  %v1016_v47 = vadd.f32 %v2401_v38, %v902_v0  ;;  %v1408_v38 = vld [vmem:[#allocation7] sm:$0xff]  ;;  %v1969_v21 = vpop.eup %1968  ;;  %v998_v13 = vadd.f32 %v2387_v23, %v2434_v34  ;;  %v1289_v31 = vmul.f32 0.5, %v1957_v22  ;;  %v1413_v22 = vld [vmem:[#allocation7 + $0x28] sm:$0xff] }
 0x167   :  { %1986 = vtanh.f32 %v1473_v6  ;;  %v904_v54 = vpop.f32.mrf.mxu0  ;;  %v1971_v29 = vpop.eup %1970  ;;  %v1424_v26 = vmul.f32 %v1408_v38, %v1392_v18  ;;  %v1396_v35 = vadd.f32 0.5, %v1380_v57  ;;  %v1000_v33 = vadd.f32 %v2389_v25, %v2439_v37 }
 0x168   :  { %v2476_v9 = vpop.f32.mrf.mxu1  ;;  %1988 = vtanh.f32 %v1016_v47  ;;  %v1018_v58 = vadd.f32 %v2403_v41, %v904_v54  ;;  %v1409_v41 = vld [vmem:[#allocation7 + $0x8] sm:$0xff]  ;;  %v1292_v0 = vmul.f32 0.5, %v1963_v48  ;;  %v1385_v3 = vmul.f32 0.5, %v1969_v21 }
 0x169   :  { %1990 = vtanh.f32 %v1476_v2  ;;  %v906_v10 = vpop.f32.mrf.mxu0  ;;  %v1425_v17 = vmul.f32 %v1409_v41, %v1393_v49  ;;  %v1484_v52 = vmul.f32 0.5, %v998_v13  ;;  %v1428_v37 = vmul.f32 %v1412_v32, %v1396_v35  ;;  %v1417_v13 = vld [vmem:[#allocation7 + $0x48] sm:$0xff] }
 0x16a   :  { %v2483_v11 = vpop.f32.mrf.mxu1  ;;  %1992 = vtanh.f32 %v1018_v58  ;;  %v1020_v12 = vadd.f32 %v2405_v45, %v906_v10  ;;  %v1397_v45 = vadd.f32 0.5, %v1381_v53  ;;  %v1388_v18 = vmul.f32 0.5, %v1971_v29 }
 0x16b   :  { %1994 = vtanh.f32 %v1477_v36  ;;  %v2492_v5 = vpop.f32.mrf.mxu0  ;;  %v1973_v6 = vpop.eup %1972  ;;  %v1400_v36 = vadd.f32 0.5, %v1384_v14  ;;  %v1401_v49 = vadd.f32 0.5, %v1385_v3  ;;  %v1305_v14 = vadd.f32 0.5, %v1289_v31  ;;  %v1421_v3 = vld [vmem:[#allocation7 + $0x68] sm:$0xff] }
 0x16c   :  { %v2490_v55 = vpop.f32.mrf.mxu1  ;;  %1996 = vtanh.f32 %v1020_v12  ;;  %v1328_v2 = vmul.f32 %v1973_v6, %v2460_v63  ;;  %v1416_v63 = vld [vmem:[#allocation7 + $0x40] sm:$0xff]  ;;  %v1429_v38 = vmul.f32 %v1413_v22, %v1397_v45 }
 0x16d   :  { %v1975_v7 = vpop.eup %1974  ;;  %1998 = vtanh.f32 %v1480_v27  ;;  %v2499_v23 = vpop.f32.mrf.mxu0  ;;  %v1485_v27 = vmul.f32 0.5, %v1000_v33  ;;  %v1433_v22 = vmul.f32 %v1417_v13, %v1401_v49 }
 0x16e   :  { %v2497_v24 = vpop.f32.mrf.mxu1  ;;  %v1977_v34 = vpop.eup %1976  ;;  %v1329_v8 = vmul.f32 %v1975_v7, %v2466_v15  ;;  %2000 = vtanh.f32 %v1481_v16  ;;  %v1440_v54 = vadd.f32 %v1424_v26, %v1328_v2  ;;  %v1432_v16 = vmul.f32 %v1416_v63, %v1400_v36  ;;  %v1420_v2 = vld [vmem:[#allocation7 + $0x60] sm:$0xff] }
 0x16f   :  { %v1979_v47 = vpop.eup %1978  ;;  %v2504_v25 = vpop.f32.mrf.mxu0  ;;  %v1389_v53 = vmul.f32 0.5, %v1977_v34  ;;  %v1404_v7 = vadd.f32 0.5, %v1388_v18 }
 0x170   :  { %v2502_v19 = vpop.f32.mrf.mxu1  ;;  %v1441_v57 = vadd.f32 %v1425_v17, %v1329_v8  ;;  %v1332_v58 = vmul.f32 %v1979_v47, %v1300_v51  ;;  %1456 = vst [vmem:[#allocation9] sm:$0xff] %v1440_v54  ;;  %2002 = vtanh.f32 %v1440_v54  ;;  %v1293_v51 = vmul.f32 0.5, %v2479_v59 }
 0x171   :  { %v1981_v48 = vpop.eup %1980  ;;  %v2508_v10 = vpop.f32.mrf.mxu0  ;;  %v1405_v31 = vadd.f32 0.5, %v1389_v53 }
 0x172   :  { %v2506_v15 = vpop.f32.mrf.mxu1  ;;  %v1983_v21 = vpop.eup %1982  ;;  %1457 = vst [vmem:[#allocation9 + $0x8] sm:$0xff] %v1441_v57  ;;  %2004 = vtanh.f32 %v1441_v57  ;;  %v1444_v12 = vadd.f32 %v1428_v37, %v1332_v58  ;;  %v1333_v41 = vmul.f32 %v1981_v48, %v2481_v60  ;;  %v1308_v60 = vadd.f32 0.5, %v1292_v0 }
 0x173   :  { %v1985_v29 = vpop.eup %1984  ;;  %2006 = vtanh.f32 %v1484_v52  ;;  %v2514_v26 = vpop.f32.mrf.mxu0  ;;  %v1309_v52 = vadd.f32 0.5, %v1293_v51  ;;  %v1436_v37 = vmul.f32 %v1420_v2, %v1404_v7  ;;  %v1437_v58 = vmul.f32 %v1421_v3, %v1405_v31 }
 0x174   :  { %v2512_v6 = vpop.f32.mrf.mxu1  ;;  %v1987_v35 = vpop.eup %1986  ;;  %1460 = vst [vmem:[#allocation9 + $0x20] sm:$0xff] %v1444_v12  ;;  %2008 = vtanh.f32 %v1444_v12  ;;  %v1445_v32 = vadd.f32 %v1429_v38, %v1333_v41  ;;  %v1336_v45 = vmul.f32 %v1985_v29, %v2485_v30  ;;  %v1504_v48 = vmul.f32 0.5, %v1983_v21 }
 0x175   :  { %v1989_v33 = vpop.eup %1988  ;;  %2010 = vtanh.f32 %v1485_v27  ;;  %v2519_v34 = vpop.f32.mrf.mxu0  ;;  %v1505_v38 = vmul.f32 0.5, %v1987_v35  ;;  %v1170_v29 = vadd.f32 %v2492_v5, %v2407_v50 }
 0x176   :  { %v2517_v59 = vpop.f32.mrf.mxu1  ;;  %v1991_v17 = vpop.eup %1990  ;;  %1461 = vst [vmem:[#allocation9 + $0x28] sm:$0xff] %v1445_v32  ;;  %2012 = vtanh.f32 %v1445_v32  ;;  %v1448_v8 = vadd.f32 %v1432_v16, %v1336_v45  ;;  %v1337_v47 = vmul.f32 %v1989_v33, %v1305_v14  ;;  %v1172_v14 = vadd.f32 %v2499_v23, %v2411_v56 }
 0x177   :  { %v1993_v36 = vpop.eup %1992  ;;  %v2523_v30 = vpop.f32.mrf.mxu0  ;;  %v1508_v13 = vmul.f32 0.5, %v1991_v17  ;;  %v1520_v32 = vadd.f32 0.5, %v1504_v48  ;;  %v1521_v23 = vadd.f32 0.5, %v1505_v38  ;;  %v1250_v2 = vmul.f32 0.5, %v1170_v29 }
 0x178   :  { %v2521_v54 = vpop.f32.mrf.mxu1  ;;  %v1995_v0 = vpop.eup %1994  ;;  %1464 = vst [vmem:[#allocation9 + $0x40] sm:$0xff] %v1448_v8  ;;  %2014 = vtanh.f32 %v1448_v8  ;;  %v1449_v63 = vadd.f32 %v1433_v22, %v1337_v47  ;;  %v1340_v18 = vmul.f32 %v1993_v36, %v1308_v60  ;;  %v1174_v60 = vadd.f32 %v2504_v25, %v2415_v44 }
 0x179   :  { %v1997_v57 = vpop.eup %1996  ;;  %v2527_v27 = vpop.f32.mrf.mxu0  ;;  %v1509_v45 = vmul.f32 0.5, %v1995_v0  ;;  %v1176_v8 = vadd.f32 %v2508_v10, %v2419_v62  ;;  %v1524_v36 = vadd.f32 0.5, %v1508_v13  ;;  %v1180_v10 = vadd.f32 %v2514_v26, %v2425_v20 }
 0x17a   :  { %v2525_v53 = vpop.f32.mrf.mxu1  ;;  %v1999_v49 = vpop.eup %1998  ;;  %1465 = vst [vmem:[#allocation9 + $0x48] sm:$0xff] %v1449_v63  ;;  %2016 = vtanh.f32 %v1449_v63  ;;  %v1452_v12 = vadd.f32 %v1436_v37, %v1340_v18  ;;  %v1341_v41 = vmul.f32 %v1997_v57, %v1309_v52  ;;  %v1254_v57 = vmul.f32 0.5, %v1174_v60 }
 0x17b   :  { %v1189_v16 = vpop.f32.mrf.mxu0  ;;  %v2001_v21 = vpop.eup %2000  ;;  %v1512_v33 = vmul.f32 0.5, %v1999_v49  ;;  %v1525_v63 = vadd.f32 0.5, %v1509_v45  ;;  %v1255_v29 = vmul.f32 0.5, %v1176_v8  ;;  %v1184_v20 = vadd.f32 %v2523_v30, %v2436_v39 }
 0x17c   :  { %v2533_v51 = vpop.f32.mrf.mxu1  ;;  %1468 = vst [vmem:[#allocation9 + $0x60] sm:$0xff] %v1452_v12  ;;  %2018 = vtanh.f32 %v1452_v12  ;;  %v1453_v35 = vadd.f32 %v1437_v58, %v1341_v41  ;;  %v1190_v7 = vadd.f32 %v1189_v16, %v2443_v40  ;;  %v1513_v22 = vmul.f32 0.5, %v2001_v21 }
 0x17d   :  { %v1191_v5 = vpop.f32.mrf.mxu0  ;;  %v2003_v56 = vpop.eup %2002  ;;  %v1251_v40 = vmul.f32 0.5, %v1172_v14  ;;  %v1528_v18 = vadd.f32 0.5, %v1512_v33  ;;  %v1258_v60 = vmul.f32 0.5, %v1180_v10 }
 0x17e   :  { %v2538_v50 = vpop.f32.mrf.mxu1  ;;  %1469 = vst [vmem:[#allocation9 + $0x68] sm:$0xff] %v1453_v35  ;;  %2020 = vtanh.f32 %v1453_v35  ;;  %v1192_v31 = vadd.f32 %v1191_v5, %v2447_v43  ;;  %v1552_v3 = vmul.f32 %v2003_v56, %v1520_v32  ;;  %v1346_v0 = vmul.f32 0.5, %v1190_v7 }
 0x17f   :  { %v2005_v17 = vpop.eup %2004  ;;  %v1193_v44 = vpop.f32.mrf.mxu0  ;;  %2022 = vtanh.f32 %v1250_v2  ;;  %v1529_v41 = vadd.f32 0.5, %v1513_v22  ;;  %v1182_v35 = vadd.f32 %v2519_v34, %v2431_v1 }
 0x180   :  { %v2543_v47 = vpop.f32.mrf.mxu1  ;;  %v2007_v25 = vpop.eup %2006  ;;  %v1553_v52 = vmul.f32 %v2005_v17, %v1521_v23  ;;  %1568 = vst [vmem:[#allocation8] sm:$0xff] %v1552_v3  ;;  %v1194_v43 = vadd.f32 %v1193_v44, %v2452_v61  ;;  %v1347_v49 = vmul.f32 0.5, %v1192_v31  ;;  %2024 = vtanh.f32 %v1251_v40 }
 0x181   :  { %v2009_v37 = vpop.eup %2008  ;;  %v1195_v48 = vpop.f32.mrf.mxu0  ;;  %v1516_v21 = vmul.f32 0.5, %v2007_v25  ;;  %2026 = vtanh.f32 %v1346_v0  ;;  %v1259_v39 = vmul.f32 0.5, %v1182_v35  ;;  %v1262_v3 = vmul.f32 0.5, %v1184_v20 }
 0x182   :  { %v2546_v58 = vpop.f32.mrf.mxu1  ;;  %v2011_v38 = vpop.eup %2010  ;;  %1569 = vst [vmem:[#allocation8 + $0x8] sm:$0xff] %v1553_v52  ;;  %v1556_v62 = vmul.f32 %v2009_v37, %v1524_v36  ;;  %v1196_v14 = vadd.f32 %v1195_v48, %v2457_v4  ;;  %2028 = vtanh.f32 %v1254_v57  ;;  %v1350_v26 = vmul.f32 0.5, %v1194_v43 }
 0x183   :  { %v2013_v12 = vpop.eup %2012  ;;  %v1199_v61 = vpop.f32.mrf.mxu0  ;;  %v1517_v32 = vmul.f32 0.5, %v2011_v38  ;;  %2030 = vtanh.f32 %v1347_v49  ;;  %v1532_v2 = vadd.f32 0.5, %v1516_v21  ;;  %v1186_v48 = vadd.f32 %v2527_v27, %v2441_v42 }
 0x184   :  { %v2551_v16 = vpop.f32.mrf.mxu1  ;;  %1572 = vst [vmem:[#allocation8 + $0x20] sm:$0xff] %v1556_v62  ;;  %v1557_v13 = vmul.f32 %v2013_v12, %v1525_v63  ;;  %v1200_v5 = vadd.f32 %v1199_v61, %v2464_v28  ;;  %2032 = vtanh.f32 %v1255_v29  ;;  %v1351_v1 = vmul.f32 0.5, %v1196_v14 }
 0x185   :  { %v2015_v7 = vpop.eup %2014  ;;  %v1201_v4 = vpop.f32.mrf.mxu0  ;;  %v1533_v22 = vadd.f32 0.5, %v1517_v32  ;;  %2034 = vtanh.f32 %v1350_v26  ;;  %v1263_v21 = vmul.f32 0.5, %v1186_v48 }
 0x186   :  { %v2557_v45 = vpop.f32.mrf.mxu1  ;;  %1573 = vst [vmem:[#allocation8 + $0x28] sm:$0xff] %v1557_v13  ;;  %v1560_v33 = vmul.f32 %v2015_v7, %v1528_v18  ;;  %v1202_v30 = vadd.f32 %v1201_v4, %v2471_v46  ;;  %2036 = vtanh.f32 %v1258_v60  ;;  %v1354_v44 = vmul.f32 0.5, %v1200_v5 }
 0x187   :  { %v2017_v56 = vpop.eup %2016  ;;  %v1203_v23 = vpop.f32.mrf.mxu0  ;;  %2038 = vtanh.f32 %v1351_v1 }
 0x188   :  { %v2560_v34 = vpop.f32.mrf.mxu1  ;;  %1576 = vst [vmem:[#allocation8 + $0x40] sm:$0xff] %v1560_v33  ;;  %v1561_v31 = vmul.f32 %v2017_v56, %v1529_v41  ;;  %v1204_v25 = vadd.f32 %v1203_v23, %v2476_v9  ;;  %2040 = vtanh.f32 %v1259_v39  ;;  %v1355_v46 = vmul.f32 0.5, %v1202_v30 }
 0x189   :  { %v2019_v17 = vpop.eup %2018  ;;  %v1205_v8 = vpop.f32.mrf.mxu0  ;;  %2042 = vtanh.f32 %v1262_v3 }
 0x18a   :  { %v2563_v40 = vpop.f32.mrf.mxu1  ;;  %1577 = vst [vmem:[#allocation8 + $0x48] sm:$0xff] %v1561_v31  ;;  %v1564_v28 = vmul.f32 %v2019_v17, %v1532_v2  ;;  %v1206_v63 = vadd.f32 %v1205_v8, %v2483_v11  ;;  %2044 = vtanh.f32 %v1354_v44  ;;  %v1358_v9 = vmul.f32 0.5, %v1204_v25 }
 0x18b   :  { %v2021_v36 = vpop.eup %2020  ;;  %v1209_v52 = vpop.f32.mrf.mxu0 }
 0x18c   :  { %v1229_v0 = vpop.f32.mrf.mxu1  ;;  %1580 = vst [vmem:[#allocation8 + $0x60] sm:$0xff] %v1564_v28  ;;  %v1565_v37 = vmul.f32 %v2021_v36, %v1533_v22  ;;  %v2023_v38 = vpop.eup %2022  ;;  %v1359_v11 = vmul.f32 0.5, %v1206_v63  ;;  %v1210_v41 = vadd.f32 %v1209_v52, %v2490_v55 }
 0x18d   :  { %v1230_v18 = vadd.f32 %v1229_v0, %v2533_v51  ;;  %v1211_v57 = vpop.f32.mrf.mxu0  ;;  %v2025_v12 = vpop.eup %2024  ;;  %v1282_v27 = vmul.f32 0.5, %v2023_v38 }
 0x18e   :  { %v1231_v43 = vpop.f32.mrf.mxu1  ;;  %1581 = vst [vmem:[#allocation8 + $0x68] sm:$0xff] %v1565_v37  ;;  %v2027_v51 = vpop.eup %2026  ;;  %v1283_v55 = vmul.f32 0.5, %v2025_v12  ;;  %v1474_v4 = vmul.f32 0.5, %v1210_v41  ;;  %v1410_v37 = vld [vmem:[#allocation7 + $0x10] sm:$0xff] }
 0x18f   :  { %2046 = vtanh.f32 %v1230_v18  ;;  %v1232_v62 = vadd.f32 %v1231_v43, %v2538_v50  ;;  %v1213_v10 = vpop.f32.mrf.mxu0  ;;  %v2029_v42 = vpop.eup %2028  ;;  %v1212_v50 = vadd.f32 %v1211_v57, %v2497_v24  ;;  %v1378_v26 = vmul.f32 0.5, %v2027_v51  ;;  %v1411_v57 = vld [vmem:[#allocation7 + $0x18] sm:$0xff]  ;;  %v1414_v51 = vld [vmem:[#allocation7 + $0x30] sm:$0xff] }
 0x190   :  { %v1233_v49 = vpop.f32.mrf.mxu1  ;;  %2048 = vtanh.f32 %v1355_v46  ;;  %v2031_v13 = vpop.eup %2030  ;;  %v1298_v1 = vadd.f32 0.5, %v1282_v27  ;;  %v1286_v23 = vmul.f32 0.5, %v2029_v42  ;;  %v1299_v22 = vadd.f32 0.5, %v1283_v55 }
 0x191   :  { %2050 = vtanh.f32 %v1232_v62  ;;  %v1234_v29 = vadd.f32 %v1233_v49, %v2543_v47  ;;  %v1215_v14 = vpop.f32.mrf.mxu0  ;;  %v2033_v20 = vpop.eup %2032  ;;  %v1214_v47 = vadd.f32 %v1213_v10, %v2502_v19  ;;  %v1379_v24 = vmul.f32 0.5, %v2031_v13 }
 0x192   :  { %v1235_v61 = vpop.f32.mrf.mxu1  ;;  %2052 = vtanh.f32 %v1358_v9  ;;  %v2035_v56 = vpop.eup %2034  ;;  %v1475_v31 = vmul.f32 0.5, %v1212_v50  ;;  %v1394_v3 = vadd.f32 0.5, %v1378_v26  ;;  %v1216_v19 = vadd.f32 %v1215_v14, %v2506_v15 }
 0x193   :  { %2054 = vtanh.f32 %v1234_v29  ;;  %v1236_v35 = vadd.f32 %v1235_v61, %v2546_v58  ;;  %v1219_v7 = vpop.f32.mrf.mxu0  ;;  %v2037_v2 = vpop.eup %2036  ;;  %v1287_v58 = vmul.f32 0.5, %v2033_v20  ;;  %v1382_v8 = vmul.f32 0.5, %v2035_v56 }
 0x194   :  { %v1239_v32 = vpop.f32.mrf.mxu1  ;;  %2056 = vtanh.f32 %v1359_v11  ;;  %v2039_v17 = vpop.eup %2038  ;;  %v1478_v28 = vmul.f32 0.5, %v1214_v47  ;;  %v1302_v0 = vadd.f32 0.5, %v1286_v23  ;;  %v1395_v46 = vadd.f32 0.5, %v1379_v24  ;;  %v1418_v23 = vld [vmem:[#allocation7 + $0x50] sm:$0xff] }
 0x195   :  { %v1240_v33 = vadd.f32 %v1239_v32, %v2551_v16  ;;  %v1221_v60 = vpop.f32.mrf.mxu0  ;;  %2058 = vtanh.f32 %v1263_v21  ;;  %v2041_v16 = vpop.eup %2040  ;;  %v1303_v18 = vadd.f32 0.5, %v1287_v58  ;;  %v1383_v43 = vmul.f32 0.5, %v2039_v17 }
 0x196   :  { %v1241_v5 = vpop.f32.mrf.mxu1  ;;  %2060 = vtanh.f32 %v1236_v35  ;;  %v2043_v52 = vpop.eup %2042  ;;  %v1290_v9 = vmul.f32 0.5, %v2037_v2  ;;  %v1479_v38 = vmul.f32 0.5, %v1216_v19  ;;  %v1426_v10 = vmul.f32 %v1410_v37, %v1394_v3 }
 0x197   :  { %v1242_v39 = vadd.f32 %v1241_v5, %v2557_v45  ;;  %2062 = vtanh.f32 %v1474_v4  ;;  %v1223_v44 = vpop.f32.mrf.mxu0  ;;  %v1220_v45 = vadd.f32 %v1219_v7, %v2512_v6  ;;  %v2045_v63 = vpop.eup %2044  ;;  %v1398_v49 = vadd.f32 0.5, %v1382_v8 }
 0x198   :  { %v1243_v30 = vpop.f32.mrf.mxu1  ;;  %2064 = vtanh.f32 %v1240_v33  ;;  %v1427_v41 = vmul.f32 %v1411_v57, %v1395_v46  ;;  %v1224_v14 = vadd.f32 %v1223_v44, %v2521_v54  ;;  %v1399_v61 = vadd.f32 0.5, %v1383_v43  ;;  %v1415_v54 = vld [vmem:[#allocation7 + $0x38] sm:$0xff] }
 0x199   :  { %v1244_v25 = vadd.f32 %v1243_v30, %v2560_v34  ;;  %2066 = vtanh.f32 %v1242_v39  ;;  %v1222_v34 = vadd.f32 %v1221_v60, %v2517_v59  ;;  %v1225_v6 = vpop.f32.mrf.mxu0  ;;  %v1482_v29 = vmul.f32 0.5, %v1220_v45  ;;  %v1419_v30 = vld [vmem:[#allocation7 + $0x58] sm:$0xff] }
 0x19a   :  { %v1245_v36 = vpop.f32.mrf.mxu1  ;;  %2068 = vtanh.f32 %v1475_v31  ;;  %v1386_v42 = vmul.f32 0.5, %v2045_v63  ;;  %v1226_v35 = vadd.f32 %v1225_v6, %v2525_v53  ;;  %v1430_v32 = vmul.f32 %v1414_v51, %v1398_v49  ;;  %v1423_v57 = vld [vmem:[#allocation7 + $0x78] sm:$0xff] }
 0x19b   :  { %v1246_v15 = vadd.f32 %v1245_v36, %v2563_v40  ;;  %2070 = vtanh.f32 %v1244_v25  ;;  %v1483_v50 = vmul.f32 0.5, %v1222_v34  ;;  %v1291_v26 = vmul.f32 0.5, %v2041_v16  ;;  %v1422_v25 = vld [vmem:[#allocation7 + $0x70] sm:$0xff] }
 0x19c   :  { %v2047_v48 = vpop.eup %2046  ;;  %2072 = vtanh.f32 %v1478_v28  ;;  %v1486_v47 = vmul.f32 0.5, %v1224_v14  ;;  %v1294_v60 = vmul.f32 0.5, %v2043_v52  ;;  %v1402_v5 = vadd.f32 0.5, %v1386_v42 }
 0x19d   :  { %v2049_v62 = vpop.eup %2048  ;;  %v1330_v12 = vmul.f32 %v2047_v48, %v1298_v1  ;;  %2074 = vtanh.f32 %v1246_v15  ;;  %v1487_v2 = vmul.f32 0.5, %v1226_v35  ;;  %v1306_v31 = vadd.f32 0.5, %v1290_v9 }
 0x19e   :  { %v2051_v11 = vpop.eup %2050  ;;  %v1387_v13 = vmul.f32 0.5, %v2049_v62  ;;  %2076 = vtanh.f32 %v1479_v38  ;;  %v1431_v39 = vmul.f32 %v1415_v54, %v1399_v61  ;;  %v1307_v3 = vadd.f32 0.5, %v1291_v26 }
 0x19f   :  { %v2053_v40 = vpop.eup %2052  ;;  %v1442_v27 = vadd.f32 %v1426_v10, %v1330_v12  ;;  %v1331_v21 = vmul.f32 %v2051_v11, %v1299_v22  ;;  %v1310_v28 = vadd.f32 0.5, %v1294_v60  ;;  %v1434_v44 = vmul.f32 %v1418_v23, %v1402_v5 }
 0x1a0   :  { %v2055_v59 = vpop.eup %2054  ;;  %v1390_v4 = vmul.f32 0.5, %v2053_v40  ;;  %v1403_v53 = vadd.f32 0.5, %v1387_v13 }
 0x1a1   :  { %v2057_v7 = vpop.eup %2056  ;;  %1458 = vst [vmem:[#allocation9 + $0x10] sm:$0xff] %v1442_v27  ;;  %2078 = vtanh.f32 %v1442_v27  ;;  %v1443_v20 = vadd.f32 %v1427_v41, %v1331_v21  ;;  %v1334_v55 = vmul.f32 %v2055_v59, %v1302_v0 }
 0x1a2   :  { %2080 = vtanh.f32 %v1482_v29  ;;  %v2059_v33 = vpop.eup %2058  ;;  %v1391_v24 = vmul.f32 0.5, %v2057_v7  ;;  %v1406_v16 = vadd.f32 0.5, %v1390_v4  ;;  %v1435_v37 = vmul.f32 %v1419_v30, %v1403_v53 }
 0x1a3   :  { %1459 = vst [vmem:[#allocation9 + $0x18] sm:$0xff] %v1443_v20  ;;  %2082 = vtanh.f32 %v1443_v20  ;;  %v1446_v56 = vadd.f32 %v1430_v32, %v1334_v55  ;;  %v2061_v1 = vpop.eup %2060  ;;  %v1295_v19 = vmul.f32 0.5, %v2059_v33 }
 0x1a4   :  { %2084 = vtanh.f32 %v1483_v50  ;;  %v2063_v58 = vpop.eup %2062  ;;  %v1335_v17 = vmul.f32 %v2061_v1, %v1303_v18  ;;  %v1407_v46 = vadd.f32 0.5, %v1391_v24  ;;  %v1438_v9 = vmul.f32 %v1422_v25, %v1406_v16 }
 0x1a5   :  { %1462 = vst [vmem:[#allocation9 + $0x30] sm:$0xff] %v1446_v56  ;;  %2086 = vtanh.f32 %v1446_v56  ;;  %v2065_v22 = vpop.eup %2064  ;;  %v1506_v43 = vmul.f32 0.5, %v2063_v58  ;;  %v1311_v48 = vadd.f32 0.5, %v1295_v19 }
 0x1a6   :  { %2088 = vtanh.f32 %v1486_v47  ;;  %v2067_v8 = vpop.eup %2066  ;;  %v1447_v36 = vadd.f32 %v1431_v39, %v1335_v17  ;;  %v1338_v52 = vmul.f32 %v2065_v22, %v1306_v31  ;;  %v1439_v49 = vmul.f32 %v1423_v57, %v1407_v46 }
 0x1a7   :  { %v2069_v0 = vpop.eup %2068  ;;  %v1339_v45 = vmul.f32 %v2067_v8, %v1307_v3  ;;  %2090 = vtanh.f32 %v1487_v2  ;;  %v1522_v41 = vadd.f32 0.5, %v1506_v43 }
 0x1a8   :  { %v2071_v63 = vpop.eup %2070  ;;  %1463 = vst [vmem:[#allocation9 + $0x38] sm:$0xff] %v1447_v36  ;;  %2092 = vtanh.f32 %v1447_v36  ;;  %v1450_v18 = vadd.f32 %v1434_v44, %v1338_v52  ;;  %v1507_v10 = vmul.f32 0.5, %v2069_v0 }
 0x1a9   :  { %v2073_v15 = vpop.eup %2072  ;;  %v1451_v38 = vadd.f32 %v1435_v37, %v1339_v45  ;;  %v1342_v34 = vmul.f32 %v2071_v63, %v1310_v28 }
 0x1aa   :  { %v2075_v62 = vpop.eup %2074  ;;  %1466 = vst [vmem:[#allocation9 + $0x50] sm:$0xff] %v1450_v18  ;;  %2094 = vtanh.f32 %v1450_v18  ;;  %v1510_v51 = vmul.f32 0.5, %v2073_v15  ;;  %v1523_v42 = vadd.f32 0.5, %v1507_v10 }
 0x1ab   :  { %1467 = vst [vmem:[#allocation9 + $0x58] sm:$0xff] %v1451_v38  ;;  %2096 = vtanh.f32 %v1451_v38  ;;  %v1454_v12 = vadd.f32 %v1438_v9, %v1342_v34  ;;  %v1343_v6 = vmul.f32 %v2075_v62, %v1311_v48  ;;  %v2077_v11 = vpop.eup %2076 }
 0x1ac   :  { %v1526_v13 = vadd.f32 0.5, %v1510_v51  ;;  %v1511_v50 = vmul.f32 0.5, %v2077_v11 }
 0x1ad   :  { %1470 = vst [vmem:[#allocation9 + $0x70] sm:$0xff] %v1454_v12  ;;  %2098 = vtanh.f32 %v1454_v12  ;;  %v1455_v14 = vadd.f32 %v1439_v49, %v1343_v6 }
 0x1ae   :  { %v2079_v29 = vpop.eup %2078 }
 0x1af   :  { %v2081_v40 = vpop.eup %2080  ;;  %v1554_v61 = vmul.f32 %v2079_v29, %v1522_v41  ;;  %1471 = vst [vmem:[#allocation9 + $0x78] sm:$0xff] %v1455_v14  ;;  %2100 = vtanh.f32 %v1455_v14 }
 0x1b0   :  { %v2083_v27 = vpop.eup %2082 }
 0x1b1   :  { %v2085_v21 = vpop.eup %2084  ;;  %1570 = vst [vmem:[#allocation8 + $0x10] sm:$0xff] %v1554_v61  ;;  %v1555_v59 = vmul.f32 %v2083_v27, %v1523_v42 }
 0x1b2   :  { %2173 = shalt.err (!%p2170_p5)
}
 0x1b3   :  { %1607 = dma.vmem_to_hbm [thread:$0]  %s1602_s2, 2048, %s2601_s4, [#allocation10], %s2217_s5, %s2217_s5, %s2218_s6   ;;  %v2087_v35 = vpop.eup %2086  ;;  %1571 = vst [vmem:[#allocation8 + $0x18] sm:$0xff] %v1555_v59  ;;  %v1514_v20 = vmul.f32 0.5, %v2081_v40  ;;  %v1515_v55 = vmul.f32 0.5, %v2085_v21  ;;  %v1527_v54 = vadd.f32 0.5, %v1511_v50 }
 0x1b4   :  { %v2089_v7 = vpop.eup %2088  ;;  %v1558_v32 = vmul.f32 %v2087_v35, %v1526_v13  ;;  %s2221_s4 = smov [#allocation8]  }
 0x1b5   :  { %v2091_v26 = vpop.eup %2090  ;;  %v1518_v47 = vmul.f32 0.5, %v2089_v7  ;;  %v1530_v60 = vadd.f32 0.5, %v1514_v20  ;;  %v1531_v56 = vadd.f32 0.5, %v1515_v55  ;;  %s1589_s12 = sshll.u32 %s2221_s4, 4  ;;  %s1590_s12 = int_to_ptr.vmem [resolvable:$true] %s1589_s12 }
 0x1b6   :  { %1574 = vst [vmem:[#allocation8 + $0x30] sm:$0xff] %v1558_v32  ;;  %v2093_v4 = vpop.eup %2092  ;;  %v1519_v1 = vmul.f32 0.5, %v2091_v26  ;;  %s2182_s13 = scalar_lea.vmem %s1590_s12, 2048  ;;  %p2187_p7 = scmp.lt.s32.totalorder %s1590_s12, %s1590_s12 }
 0x1b7   :  { %v1559_v33 = vmul.f32 %v2093_v4, %v1527_v54  ;;  %v2095_v5 = vpop.eup %2094  ;;  %v1534_v2 = vadd.f32 0.5, %v1518_v47  ;;  %p2183_p6 = scmp.ne.s32.totalorder %s1590_s12, %s2182_s13  ;;  %p2188_p8 = scmp.lt.s32.totalorder %s2182_s13, %s2182_s13 }
 0x1b8   :  { %v2097_v23 = vpop.eup %2096  ;;  %v1562_v53 = vmul.f32 %v2095_v5, %v1530_v60  ;;  %v1535_v39 = vadd.f32 0.5, %v1519_v1 }
 0x1b9   :  { %1575 = vst [vmem:[#allocation8 + $0x38] sm:$0xff] %v1559_v33  ;;  %v1563_v24 = vmul.f32 %v2097_v23, %v1531_v56  ;;  %p2189_p9 = por %p2188_p8, %p2187_p7 }
 0x1ba   :  { %v2099_v58 = vpop.eup %2098  ;;  %1578 = vst [vmem:[#allocation8 + $0x50] sm:$0xff] %v1562_v53 }
 0x1bb   :  { %1579 = vst [vmem:[#allocation8 + $0x58] sm:$0xff] %v1563_v24  ;;  %v1566_v31 = vmul.f32 %v2099_v58, %v1534_v2  ;;  %p2190_p10 = pnand %p2189_p9, %p2183_p6 }
 0x1bc   :  { %v2101_v30 = vpop.eup %2100 }
 0x1bd   :  { %1582 = vst [vmem:[#allocation8 + $0x70] sm:$0xff] %v1566_v31  ;;  %v1567_v17 = vmul.f32 %v2101_v30, %v1535_v39 }
 0x1bf   :  { %1583 = vst [vmem:[#allocation8 + $0x78] sm:$0xff] %v1567_v17 }
 0x1c0   :  { %2193 = shalt.err (!%p2190_p10)
}
 0x1c1   :  { %1595 = dma.vmem_to_hbm [thread:$0]  %s1590_s12, 2048, %s2600_s3, [#allocation4], %s2217_s5, %s2217_s5, %s2218_s6  }
 0x1c2   :  { %2206 = dma.done.wait [#allocation4], 2048  }
 0x1c3   :  { %2207 = vsyncadd [#allocation4], 4294965248 }
 0x1c4   :  { %2208 = dma.done.wait [#allocation10], 2048  }
 0x1c5   :  { %2209 = vsyncadd [#allocation10], 4294965248 }
 0x1c6   :  { %1614 = vsyncpa [#allocation3], 1 }
 0x1c7   :  { %1615 = vsyncpa [#allocation6], 1 }
 0x1c8   :  { %1616 = vsyncpa [#allocation4], 1 }
 0x1c9   :  { %1617 = vsyncpa [#allocation10], 1 }

</bundles_post_ra>
